<compile_context>
chip_gen: v7x
topology: tpu7x:2x2x1
jax: 0.10.0
libtpu: 0.0.40
codegen_flags: <defaults>
</compile_context>

<pallas_src>
import functools

import numpy as np
import jax
import jax.numpy as jnp
from jax.experimental import pallas as pl
from jax.experimental.pallas import tpu as pltpu


def make_kernel(k):
    """numpy version of StyleGAN2 make_kernel (deterministic, trace-time constant)."""
    k = np.asarray(k, dtype=np.float32)
    if k.ndim == 1:
        k = k[None, :] * k[:, None]
    k = k / k.sum()
    return k


# --------------------------------------------------------------------------------------
# Kernel bodies
# --------------------------------------------------------------------------------------

def _blur_body_planes_on_lanes(x_ref, o_ref, xp_ref, tmp_ref, *,
                               taps_h, taps_v, pad0, h_in, w_in, h_out, w_out):
    """Separable FIR blur; plane index on the lane (last) axis.

    x_ref  : (H, W, P)          input planes
    o_ref  : (H_out, W_out, P)  output planes
    xp_ref : (H_pad, W_pad, P)  f32 scratch: zero-padded input
    tmp_ref: (H_pad, W_out, P)  f32 scratch: horizontal-pass result
    """
    h_pad, w_pad, p = xp_ref.shape

    # Zero only the thin pad border; the interior is fully overwritten just below.
    if pad0 > 0:
        xp_ref[:pad0, :, :] = jnp.zeros((pad0, w_pad, p), jnp.float32)
        xp_ref[:, :pad0, :] = jnp.zeros((h_pad, pad0, p), jnp.float32)
    if pad0 + h_in < h_pad:
        xp_ref[pad0 + h_in:, :, :] = jnp.zeros((h_pad - pad0 - h_in, w_pad, p), jnp.float32)
    if pad0 + w_in < w_pad:
        xp_ref[:, pad0 + w_in:, :] = jnp.zeros((h_pad, w_pad - pad0 - w_in, p), jnp.float32)
    xp_ref[pad0:pad0 + h_in, pad0:pad0 + w_in, :] = x_ref[...].astype(jnp.float32)

    # Horizontal (W) pass: shifts along the sublane axis; lanes stay dense.
    th = taps_h[0] * xp_ref[:, 0:w_out, :]
    for j in range(1, len(taps_h)):
        th = th + taps_h[j] * xp_ref[:, j:j + w_out, :]
    tmp_ref[...] = th                     # full overwrite -> no zero fill needed

    # Vertical (H) pass: shifts along the leading (non-minor) axis.
    acc = taps_v[0] * tmp_ref[0:h_out, :, :]
    for i in range(1, len(taps_v)):
        acc = acc + taps_v[i] * tmp_ref[i:i + h_out, :, :]
    o_ref[...] = acc.astype(o_ref.dtype)


def _blur_body_w_on_lanes(x_ref, o_ref, xw_ref, tmp_ref, *,
                          taps_h, taps_v, pad0, h_in, w_in, h_out, w_out):
    """Separable FIR blur; W on the lane axis (fallback for W_out >= 128).

    x_ref  : (B, H, W)          input planes
    o_ref  : (B, H_out, W_out)  output planes
    xw_ref : (B, H, W_pad)      f32 scratch: W-padded input
    tmp_ref: (B, H_pad, W_out)  f32 scratch: H-padded horizontal-pass result
    """
    b, h, w_pad = xw_ref.shape
    _, h_pad, wo = tmp_ref.shape

    # Zero only the pad columns / rows (interiors are fully overwritten below).
    if pad0 > 0:
        xw_ref[:, :, :pad0] = jnp.zeros((b, h, pad0), jnp.float32)
        tmp_ref[:, :pad0, :] = jnp.zeros((b, pad0, wo), jnp.float32)
    if pad0 + w_in < w_pad:
        xw_ref[:, :, pad0 + w_in:] = jnp.zeros((b, h, w_pad - pad0 - w_in), jnp.float32)
    if pad0 + h_in < h_pad:
        tmp_ref[:, pad0 + h_in:, :] = jnp.zeros((b, h_pad - pad0 - h_in, wo), jnp.float32)

    xw_ref[:, :, pad0:pad0 + w_in] = x_ref[...].astype(jnp.float32)

    th = taps_h[0] * xw_ref[:, :, 0:w_out]
    for j in range(1, len(taps_h)):
        th = th + taps_h[j] * xw_ref[:, :, j:j + w_out]
    tmp_ref[:, pad0:pad0 + h_in, :] = th

    acc = taps_v[0] * tmp_ref[:, 0:h_out, :]
    for i in range(1, len(taps_v)):
        acc = acc + taps_v[i] * tmp_ref[:, i:i + h_out, :]
    o_ref[...] = acc.astype(o_ref.dtype)


# --------------------------------------------------------------------------------------
# Wrapper
# --------------------------------------------------------------------------------------

def _vmem_budget():
    """Return (vmem_limit_bytes, per-step footprint budget) sized from physical VMEM."""
    try:
        cap = int(pltpu.get_tpu_info().vmem_capacity_bytes)
    except Exception:
        cap = 64 << 20                      # conservative (v7x-sized) fallback
    limit = int(min(cap * 3 // 4, 100 << 20))   # ~96 MiB on 128-MiB parts, ~48 MiB on v7x
    return limit, limit // 2                     # leave headroom for double buffering


def _num_tensorcores():
    """Best-effort TensorCore count; falls back to 1 (safe: no forced grid split)."""
    try:
        info = pltpu.get_tpu_info()
        for name in ("num_cores", "core_count", "num_tensorcores"):
            v = getattr(info, name, None)
            if v:
                return int(v)
    except Exception:
        pass
    return 1


def _largest_divisor_leq(n, cap):
    cap = max(1, min(n, cap))
    for d in range(cap, 0, -1):
        if n % d == 0:
            return d
    return 1


def blur(x, kernel_1d=(1, 3, 3, 1), pad=(2, 1), upsample_factor=1):
    """Equivalent of Blur(kernel_1d, pad, upsample_factor).forward(x) for NCHW input."""
    N, C, H, W = x.shape
    pad0, pad1 = int(pad[0]), int(pad[1])
    assert pad0 >= 0 and pad1 >= 0, "StyleGAN2 Blur always uses non-negative pads"

    k1 = np.asarray(kernel_1d, dtype=np.float32)
    # TODO(synk): non-separable 2-D blur kernels (never used by StyleGAN2's Blur) would need
    # a dense kh*kw tap path; only 1-D separable kernels are handled here.
    assert k1.ndim == 1, "only 1-D (separable) blur kernels supported"
    k1 = k1 / k1.sum()
    scale = float(upsample_factor ** 2) if upsample_factor > 1 else 1.0
    ksize = int(k1.shape[0])

    # upfirdn2d uses F.conv2d (cross-correlation) with the flipped kernel -> flip the taps.
    taps_h = tuple(float(v) for v in k1[::-1])
    taps_v = tuple(float(v) * scale for v in k1[::-1])

    H_pad = H + pad0 + pad1
    W_pad = W + pad0 + pad1
    H_out = H_pad - ksize + 1
    W_out = W_pad - ksize + 1
    assert H_out > 0 and W_out > 0

    NC = N * C
    itemsize = jnp.dtype(x.dtype).itemsize
    vmem_limit, step_budget = _vmem_budget()
    cores = _num_tensorcores()

    # ---------------- lane-dense plane path (StyleGAN2's small feature maps) ----------------
    p_tile = None
    if W_out < 128:
        bytes_per_plane = (2 * itemsize * (H * W + H_out * W_out)      # double-buffered in/out
                           + 4 * (H_pad * W_pad + H_pad * W_out))      # f32 scratches
        max_p = max(1, step_budget // bytes_per_plane)
        if NC <= max_p:
            p_tile = NC
            if cores >= 2 and NC % 256 == 0:        # give each TensorCore >= 1 grid step
                p_tile = max(128, ((NC // 2) // 128) * 128)
        elif NC % 128 == 0 and max_p >= 128:
            p_tile = (max_p // 128) * 128           # lane-aligned tile that divides NC
            while NC % p_tile != 0:
                p_tile -= 128
        # else: ragged plane count that doesn't fit -> fall through to plane-major path

    if p_tile is not None:
        # Layout plumbing only: present planes lane-dense as (H, W, NC).
        xt = jnp.transpose(x.reshape(NC, H, W), (1, 2, 0))
        body = functools.partial(
            _blur_body_planes_on_lanes, taps_h=taps_h, taps_v=taps_v, pad0=pad0,
            h_in=H, w_in=W, h_out=H_out, w_out=W_out)
        out_t = pl.pallas_call(
            body,
            out_shape=jax.ShapeDtypeStruct((H_out, W_out, NC), x.dtype),
            grid=(NC // p_tile,),
            in_specs=[pl.BlockSpec((H, W, p_tile), lambda i: (0, 0, i))],
            out_specs=pl.BlockSpec((H_out, W_out, p_tile), lambda i: (0, 0, i)),
            scratch_shapes=[pltpu.VMEM((H_pad, W_pad, p_tile), jnp.float32),
                            pltpu.VMEM((H_pad, W_out, p_tile), jnp.float32)],
            compiler_params=pltpu.CompilerParams(
                dimension_semantics=("parallel",),
                vmem_limit_bytes=vmem_limit),
        )(xt)
        return jnp.transpose(out_t, (2, 0, 1)).reshape(N, C, H_out, W_out)

    # ---------------- plane-major fallback path (W_out >= 128, or ragged plane count) -------
    # TODO(synk): very large planes (>= ~1024^2) on 64-MiB-VMEM parts would additionally want
    # H-tiling with a (ksize-1)-row halo; whole-plane blocks are used here.
    bytes_per_plane = (2 * itemsize * (H * W + H_out * W_out)
                       + 4 * (H * W_pad + H_pad * W_out))
    max_b = max(1, step_budget // bytes_per_plane)
    b_tile = _largest_divisor_leq(NC, max_b)        # divides NC -> no wrapper-side jnp.pad

    xf = x.reshape(NC, H, W)
    body = functools.partial(
        _blur_body_w_on_lanes, taps_h=taps_h, taps_v=taps_v, pad0=pad0,
        h_in=H, w_in=W, h_out=H_out, w_out=W_out)
    out_flat = pl.pallas_call(
        body,
        out_shape=jax.ShapeDtypeStruct((NC, H_out, W_out), x.dtype),
        grid=(NC // b_tile,),
        in_specs=[pl.BlockSpec((b_tile, H, W), lambda i: (i, 0, 0))],
        out_specs=pl.BlockSpec((b_tile, H_out, W_out), lambda i: (i, 0, 0)),
        scratch_shapes=[pltpu.VMEM((b_tile, H, W_pad), jnp.float32),
                        pltpu.VMEM((b_tile, H_pad, W_out), jnp.float32)],
        compiler_params=pltpu.CompilerParams(
            dimension_semantics=("parallel",),
            vmem_limit_bytes=vmem_limit),
    )(xf)
    return out_flat.reshape(N, C, H_out, W_out)


# --------------------------------------------------------------------------------------
# Pure-JAX reference and self-test
# --------------------------------------------------------------------------------------

def _reference_blur(x, kernel_1d=(1, 3, 3, 1), pad=(2, 1), upsample_factor=1):
    """Pure-JAX reference (lax conv), mirrors upfirdn2d_native with up=down=1."""
    N, C, H, W = x.shape
    k = make_kernel(kernel_1d)
    if upsample_factor > 1:
        k = k * (upsample_factor ** 2)
    pad0, pad1 = pad
    w = jnp.asarray(np.flip(k, (0, 1)).copy())[None, None]       # (1,1,kh,kw)
    xf = x.reshape(N * C, 1, H, W).astype(jnp.float32)
    out = jax.lax.conv_general_dilated(
        xf, w,
        window_strides=(1, 1),
        padding=((pad0, pad1), (pad0, pad1)),
        dimension_numbers=("NCHW", "OIHW", "NCHW"))
    return out.reshape(N, C, out.shape[-2], out.shape[-1]).astype(x.dtype)


if __name__ == "__main__":
    key = jax.random.PRNGKey(0)
    x = jax.random.normal(key, (2, 4, 16, 16), dtype=jnp.float32)

    # StyleGAN2 upsample-path Blur: kernel (1,3,3,1), pad=(2,1), upsample_factor=2.
    out = jax.block_until_ready(blur(x, (1, 3, 3, 1), pad=(2, 1), upsample_factor=2))
    ref = jax.block_until_ready(_reference_blur(x, (1, 3, 3, 1), pad=(2, 1), upsample_factor=2))
    assert out.shape == (2, 4, 16, 16), out.shape
    np.testing.assert_allclose(np.asarray(out), np.asarray(ref), rtol=1e-5, atol=1e-5)

    # StyleGAN2 downsample-path Blur: pad=(2,2), no kernel scaling.
    out2 = jax.block_until_ready(blur(x, (1, 3, 3, 1), pad=(2, 2), upsample_factor=1))
    ref2 = jax.block_until_ready(_reference_blur(x, (1, 3, 3, 1), pad=(2, 2), upsample_factor=1))
    assert out2.shape == (2, 4, 17, 17), out2.shape
    np.testing.assert_allclose(np.asarray(out2), np.asarray(ref2), rtol=1e-5, atol=1e-5)

    # Exercise the plane-major fallback path (W_out >= 128) as well.
    xw = jax.random.normal(jax.random.PRNGKey(1), (1, 2, 8, 128), dtype=jnp.float32)
    out3 = jax.block_until_ready(blur(xw, (1, 3, 3, 1), pad=(2, 1), upsample_factor=1))
    ref3 = jax.block_until_ready(_reference_blur(xw, (1, 3, 3, 1), pad=(2, 1), upsample_factor=1))
    assert out3.shape == ref3.shape, (out3.shape, ref3.shape)
    np.testing.assert_allclose(np.asarray(out3), np.asarray(ref3), rtol=1e-5, atol=1e-5)

    print("KERNEL_OK")
</pallas_src>

<mosaic_0001>
module attributes {stable_mosaic.version = 11 : i64} {
  func.func @_blur_body_planes_on_lanes(%arg0: i32, %arg1: memref<16x16x8xf32, #tpu.memory_space<vmem>>, %arg2: memref<16x16x8xf32, #tpu.memory_space<vmem>>, %arg3: memref<19x19x8xf32, #tpu.memory_space<vmem>>, %arg4: memref<19x16x8xf32, #tpu.memory_space<vmem>>) attributes {dimension_semantics = [#tpu.dimension_semantics<parallel>], iteration_bounds = array<i64: 1>, scalar_prefetch = 0 : i64, scratch_operands = 2 : i64, tpu.core_type = #tpu.core_type<tc>, window_params = [{transform_indices = @transform_0, window_bounds = array<i64: 16, 16, 8>}, {transform_indices = @transform_1, window_bounds = array<i64: 16, 16, 8>}]} {
    %cst = arith.constant 0.000000e+00 : f32
    %0 = vector.broadcast %cst : f32 to vector<2x19x8xf32>
    %c0 = arith.constant 0 : index
    %c0_0 = arith.constant 0 : index
    %c0_1 = arith.constant 0 : index
    %1 = vector.load %arg3[%c0, %c0_0, %c0_1] : memref<19x19x8xf32, #tpu.memory_space<vmem>>, vector<2x19x8xf32>
    tpu.vector_store %arg3[%c0, %c0_0, %c0_1], %0 {strides = array<i32>} : memref<19x19x8xf32, #tpu.memory_space<vmem>>, vector<2x19x8xf32>,
    %cst_2 = arith.constant 0.000000e+00 : f32
    %2 = vector.broadcast %cst_2 : f32 to vector<19x2x8xf32>
    %c0_3 = arith.constant 0 : index
    %c0_4 = arith.constant 0 : index
    %c0_5 = arith.constant 0 : index
    %3 = vector.load %arg3[%c0_3, %c0_4, %c0_5] : memref<19x19x8xf32, #tpu.memory_space<vmem>>, vector<19x2x8xf32>
    tpu.vector_store %arg3[%c0_3, %c0_4, %c0_5], %2 {strides = array<i32>} : memref<19x19x8xf32, #tpu.memory_space<vmem>>, vector<19x2x8xf32>,
    %cst_6 = arith.constant 0.000000e+00 : f32
    %4 = vector.broadcast %cst_6 : f32 to vector<1x19x8xf32>
    %c18 = arith.constant 18 : index
    %c0_7 = arith.constant 0 : index
    %c0_8 = arith.constant 0 : index
    %5 = vector.load %arg3[%c18, %c0_7, %c0_8] : memref<19x19x8xf32, #tpu.memory_space<vmem>>, vector<1x19x8xf32>
    tpu.vector_store %arg3[%c18, %c0_7, %c0_8], %4 {strides = array<i32>} : memref<19x19x8xf32, #tpu.memory_space<vmem>>, vector<1x19x8xf32>,
    %cst_9 = arith.constant 0.000000e+00 : f32
    %6 = vector.broadcast %cst_9 : f32 to vector<19x1x8xf32>
    %c0_10 = arith.constant 0 : index
    %c18_11 = arith.constant 18 : index
    %c0_12 = arith.constant 0 : index
    %7 = vector.load %arg3[%c0_10, %c18_11, %c0_12] : memref<19x19x8xf32, #tpu.memory_space<vmem>>, vector<19x1x8xf32>
    tpu.vector_store %arg3[%c0_10, %c18_11, %c0_12], %6 {strides = array<i32>} : memref<19x19x8xf32, #tpu.memory_space<vmem>>, vector<19x1x8xf32>,
    %c0_13 = arith.constant 0 : index
    %c0_14 = arith.constant 0 : index
    %c0_15 = arith.constant 0 : index
    %8 = vector.load %arg1[%c0_13, %c0_14, %c0_15] : memref<16x16x8xf32, #tpu.memory_space<vmem>>, vector<16x16x8xf32>
    %c2 = arith.constant 2 : index
    %c2_16 = arith.constant 2 : index
    %c0_17 = arith.constant 0 : index
    %9 = vector.load %arg3[%c2, %c2_16, %c0_17] : memref<19x19x8xf32, #tpu.memory_space<vmem>>, vector<16x16x8xf32>
    tpu.vector_store %arg3[%c2, %c2_16, %c0_17], %8 {strides = array<i32>} : memref<19x19x8xf32, #tpu.memory_space<vmem>>, vector<16x16x8xf32>,
    %c0_18 = arith.constant 0 : index
    %c0_19 = arith.constant 0 : index
    %c0_20 = arith.constant 0 : index
    %10 = vector.load %arg3[%c0_18, %c0_19, %c0_20] : memref<19x19x8xf32, #tpu.memory_space<vmem>>, vector<19x16x8xf32>
    %cst_21 = arith.constant 1.250000e-01 : f32
    %11 = vector.broadcast %cst_21 : f32 to vector<19x16x8xf32>
    %12 = arith.mulf %11, %10 : vector<19x16x8xf32>
    %c0_22 = arith.constant 0 : index
    %c1 = arith.constant 1 : index
    %c0_23 = arith.constant 0 : index
    %13 = vector.load %arg3[%c0_22, %c1, %c0_23] : memref<19x19x8xf32, #tpu.memory_space<vmem>>, vector<19x16x8xf32>
    %cst_24 = arith.constant 3.750000e-01 : f32
    %14 = vector.broadcast %cst_24 : f32 to vector<19x16x8xf32>
    %15 = arith.mulf %14, %13 : vector<19x16x8xf32>
    %16 = arith.addf %12, %15 : vector<19x16x8xf32>
    %c0_25 = arith.constant 0 : index
    %c2_26 = arith.constant 2 : index
    %c0_27 = arith.constant 0 : index
    %17 = vector.load %arg3[%c0_25, %c2_26, %c0_27] : memref<19x19x8xf32, #tpu.memory_space<vmem>>, vector<19x16x8xf32>
    %cst_28 = arith.constant 3.750000e-01 : f32
    %18 = vector.broadcast %cst_28 : f32 to vector<19x16x8xf32>
    %19 = arith.mulf %18, %17 : vector<19x16x8xf32>
    %20 = arith.addf %16, %19 : vector<19x16x8xf32>
    %c0_29 = arith.constant 0 : index
    %c3 = arith.constant 3 : index
    %c0_30 = arith.constant 0 : index
    %21 = vector.load %arg3[%c0_29, %c3, %c0_30] : memref<19x19x8xf32, #tpu.memory_space<vmem>>, vector<19x16x8xf32>
    %cst_31 = arith.constant 1.250000e-01 : f32
    %22 = vector.broadcast %cst_31 : f32 to vector<19x16x8xf32>
    %23 = arith.mulf %22, %21 : vector<19x16x8xf32>
    %24 = arith.addf %20, %23 : vector<19x16x8xf32>
    %c0_32 = arith.constant 0 : index
    %c0_33 = arith.constant 0 : index
    %c0_34 = arith.constant 0 : index
    %25 = vector.load %arg4[%c0_32, %c0_33, %c0_34] : memref<19x16x8xf32, #tpu.memory_space<vmem>>, vector<19x16x8xf32>
    tpu.vector_store %arg4[%c0_32, %c0_33, %c0_34], %24 {strides = array<i32>} : memref<19x16x8xf32, #tpu.memory_space<vmem>>, vector<19x16x8xf32>,
    %c0_35 = arith.constant 0 : index
    %c0_36 = arith.constant 0 : index
    %c0_37 = arith.constant 0 : index
    %26 = vector.load %arg4[%c0_35, %c0_36, %c0_37] : memref<19x16x8xf32, #tpu.memory_space<vmem>>, vector<16x16x8xf32>
    %cst_38 = arith.constant 5.000000e-01 : f32
    %27 = vector.broadcast %cst_38 : f32 to vector<16x16x8xf32>
    %28 = arith.mulf %27, %26 : vector<16x16x8xf32>
    %c1_39 = arith.constant 1 : index
    %c0_40 = arith.constant 0 : index
    %c0_41 = arith.constant 0 : index
    %29 = vector.load %arg4[%c1_39, %c0_40, %c0_41] : memref<19x16x8xf32, #tpu.memory_space<vmem>>, vector<16x16x8xf32>
    %cst_42 = arith.constant 1.500000e+00 : f32
    %30 = vector.broadcast %cst_42 : f32 to vector<16x16x8xf32>
    %31 = arith.mulf %30, %29 : vector<16x16x8xf32>
    %32 = arith.addf %28, %31 : vector<16x16x8xf32>
    %c2_43 = arith.constant 2 : index
    %c0_44 = arith.constant 0 : index
    %c0_45 = arith.constant 0 : index
    %33 = vector.load %arg4[%c2_43, %c0_44, %c0_45] : memref<19x16x8xf32, #tpu.memory_space<vmem>>, vector<16x16x8xf32>
    %cst_46 = arith.constant 1.500000e+00 : f32
    %34 = vector.broadcast %cst_46 : f32 to vector<16x16x8xf32>
    %35 = arith.mulf %34, %33 : vector<16x16x8xf32>
    %36 = arith.addf %32, %35 : vector<16x16x8xf32>
    %c3_47 = arith.constant 3 : index
    %c0_48 = arith.constant 0 : index
    %c0_49 = arith.constant 0 : index
    %37 = vector.load %arg4[%c3_47, %c0_48, %c0_49] : memref<19x16x8xf32, #tpu.memory_space<vmem>>, vector<16x16x8xf32>
    %cst_50 = arith.constant 5.000000e-01 : f32
    %38 = vector.broadcast %cst_50 : f32 to vector<16x16x8xf32>
    %39 = arith.mulf %38, %37 : vector<16x16x8xf32>
    %40 = arith.addf %36, %39 : vector<16x16x8xf32>
    %c0_51 = arith.constant 0 : index
    %c0_52 = arith.constant 0 : index
    %c0_53 = arith.constant 0 : index
    %41 = vector.load %arg2[%c0_51, %c0_52, %c0_53] : memref<16x16x8xf32, #tpu.memory_space<vmem>>, vector<16x16x8xf32>
    tpu.vector_store %arg2[%c0_51, %c0_52, %c0_53], %40 {strides = array<i32>} : memref<16x16x8xf32, #tpu.memory_space<vmem>>, vector<16x16x8xf32>,
    return
  }
  func.func @transform_0(%arg0: i32) -> (i32, i32, i32) {
    %c0_i32 = arith.constant 0 : i32
    %c0_i32_0 = arith.constant 0 : i32
    %c0_i32_1 = arith.constant 0 : i32
    return %c0_i32, %c0_i32_0, %arg0 : i32, i32, i32
  }
  func.func @transform_1(%arg0: i32) -> (i32, i32, i32) {
    %c0_i32 = arith.constant 0 : i32
    %c0_i32_0 = arith.constant 0 : i32
    %c0_i32_1 = arith.constant 0 : i32
    return %c0_i32, %c0_i32_0, %arg0 : i32, i32, i32
  }
}

</mosaic_0001>

<bundles_post_ra>
// kernel: tpu_custom_call.1
= control target key start
LH: loop header
LB: loop body
LE: loop exit
PB: predicated region body
PF: predicated region fallthrough
CT: control target
= control target key end

     0   :  { %vm8_vm0 = vcmask 64512   ;;  %vm11_vm1 = vcmask 59392   ;;  %vm16_vm2 = vcmask 58368   ;;  %v973_v0 = vmov 0.0   ;;  %s1322_s0 = inlined_call_operand.vmem [shape: f32[16,16,8], index: 0, kind: input, shape index: {}]   ;;  %s1323_s1 = inlined_call_operand.vmem [shape: f32[16,16,8], index: 1, kind: output, shape index: {}]  }
   0x1   :  { %9 = vst.msk [vmem:[#allocation2] sm:$0xff] %vm8_vm0, %v973_v0  ;;  %10 = vst.msk [vmem:[#allocation2 + $0x8] sm:$0xff] %vm8_vm0, %v973_v0  ;;  %vm40_vm3 = vcmask 57344   ;;  %v60_v1 = vld [vmem:[%s1322_s0] sm:$0xff]  ;;  %v61_v2 = vld [vmem:[%s1322_s0 + $0x8] sm:$0xff] }
   0x2   :  { %13 = vst.msk [vmem:[#allocation2 + $0x18] sm:$0xff] %vm8_vm0, %v973_v0  ;;  %14 = vst.msk [vmem:[#allocation2 + $0x20] sm:$0xff] %vm8_vm0, %v973_v0  ;;  %v62_v3 = vld [vmem:[%s1322_s0 + $0x10] sm:$0xff]  ;;  %v63_v4 = vld [vmem:[%s1322_s0 + $0x18] sm:$0xff] }
   0x3   :  { %38 = vst.msk [vmem:[#allocation2 + $0x1b8] sm:$0xff] %vm8_vm0, %v973_v0  ;;  %93 = vst.msk [vmem:[#allocation2 + $0x32] sm:$0xff] %vm8_vm0, %v60_v1  ;;  %v64_v5 = vld [vmem:[%s1322_s0 + $0x20] sm:$0xff]  ;;  %v65_v6 = vld [vmem:[%s1322_s0 + $0x28] sm:$0xff] }
   0x4   :  { %12 = vst.msk [vmem:[#allocation2 + $0x10] sm:$0x7] %vm11_vm1, %v973_v0  ;;  %15 = vst.msk [vmem:[#allocation2 + $0x28] sm:$0x7] %vm11_vm1, %v973_v0  ;;  %v66_v7 = vld [vmem:[%s1322_s0 + $0x30] sm:$0xff]  ;;  %v67_v8 = vld [vmem:[%s1322_s0 + $0x38] sm:$0xff] }
   0x5   :  { %39 = vst.msk [vmem:[#allocation2 + $0x1c0] sm:$0x7] %vm11_vm1, %v973_v0  ;;  %v68_v9 = vld [vmem:[%s1322_s0 + $0x40] sm:$0xff]  ;;  %v69_v10 = vld [vmem:[%s1322_s0 + $0x48] sm:$0xff]  ;;  %v70_v11 = vld [vmem:[%s1322_s0 + $0x50] sm:$0xff] }
   0x6   :  { %35 = vst.msk [vmem:[#allocation2 + $0x1b0] sm:$0x3] %vm16_vm2, %v973_v0  ;;  %19 = vst.msk [vmem:[#allocation2 + $0x30] sm:$0x3] %vm16_vm2, %v973_v0  ;;  %v71_v12 = vld [vmem:[%s1322_s0 + $0x58] sm:$0xff]  ;;  %v72_v13 = vld [vmem:[%s1322_s0 + $0x60] sm:$0xff] }
   0x7   :  { %20 = vst.msk [vmem:[#allocation2 + $0x48] sm:$0x3] %vm16_vm2, %v973_v0  ;;  %21 = vst.msk [vmem:[#allocation2 + $0x60] sm:$0x3] %vm16_vm2, %v973_v0  ;;  %v73_v14 = vld [vmem:[%s1322_s0 + $0x68] sm:$0xff]  ;;  %v74_v15 = vld [vmem:[%s1322_s0 + $0x70] sm:$0xff] }
   0x8   :  { %22 = vst.msk [vmem:[#allocation2 + $0x78] sm:$0x3] %vm16_vm2, %v973_v0  ;;  %23 = vst.msk [vmem:[#allocation2 + $0x90] sm:$0x3] %vm16_vm2, %v973_v0  ;;  %v75_v16 = vld [vmem:[%s1322_s0 + $0x78] sm:$0xff]  ;;  %v76_v17 = vld [vmem:[%s1322_s0 + $0x80] sm:$0xff] }
   0x9   :  { %24 = vst.msk [vmem:[#allocation2 + $0xa8] sm:$0x3] %vm16_vm2, %v973_v0  ;;  %25 = vst.msk [vmem:[#allocation2 + $0xc0] sm:$0x3] %vm16_vm2, %v973_v0  ;;  %v77_v18 = vld [vmem:[%s1322_s0 + $0x88] sm:$0xff]  ;;  %v78_v19 = vld [vmem:[%s1322_s0 + $0x90] sm:$0xff] }
   0xa   :  { %26 = vst.msk [vmem:[#allocation2 + $0xd8] sm:$0x3] %vm16_vm2, %v973_v0  ;;  %27 = vst.msk [vmem:[#allocation2 + $0xf0] sm:$0x3] %vm16_vm2, %v973_v0  ;;  %v79_v20 = vld [vmem:[%s1322_s0 + $0x98] sm:$0xff]  ;;  %v80_v21 = vld [vmem:[%s1322_s0 + $0xa0] sm:$0xff] }
   0xb   :  { %28 = vst.msk [vmem:[#allocation2 + $0x108] sm:$0x3] %vm16_vm2, %v973_v0  ;;  %29 = vst.msk [vmem:[#allocation2 + $0x120] sm:$0x3] %vm16_vm2, %v973_v0  ;;  %v81_v22 = vld [vmem:[%s1322_s0 + $0xa8] sm:$0xff]  ;;  %v82_v23 = vld [vmem:[%s1322_s0 + $0xb0] sm:$0xff] }
   0xc   :  { %30 = vst.msk [vmem:[#allocation2 + $0x138] sm:$0x3] %vm16_vm2, %v973_v0  ;;  %31 = vst.msk [vmem:[#allocation2 + $0x150] sm:$0x3] %vm16_vm2, %v973_v0  ;;  %v83_v24 = vld [vmem:[%s1322_s0 + $0xb8] sm:$0xff]  ;;  %v84_v25 = vld [vmem:[%s1322_s0 + $0xc0] sm:$0xff] }
   0xd   :  { %32 = vst.msk [vmem:[#allocation2 + $0x168] sm:$0x3] %vm16_vm2, %v973_v0  ;;  %33 = vst.msk [vmem:[#allocation2 + $0x180] sm:$0x3] %vm16_vm2, %v973_v0  ;;  %v85_v26 = vld [vmem:[%s1322_s0 + $0xc8] sm:$0xff]  ;;  %v86_v27 = vld [vmem:[%s1322_s0 + $0xd0] sm:$0xff] }
   0xe   :  { %34 = vst.msk [vmem:[#allocation2 + $0x198] sm:$0x3] %vm16_vm2, %v973_v0  ;;  %17 = vst.msk [vmem:[#allocation2] sm:$0x3] %vm16_vm2, %v973_v0  ;;  %v87_v28 = vld [vmem:[%s1322_s0 + $0xd8] sm:$0xff]  ;;  %v88_v29 = vld [vmem:[%s1322_s0 + $0xe0] sm:$0xff] }
   0xf   :  { %18 = vst.msk [vmem:[#allocation2 + $0x18] sm:$0x3] %vm16_vm2, %v973_v0  ;;  %v89_v30 = vld [vmem:[%s1322_s0 + $0xe8] sm:$0xff]  ;;  %v90_v31 = vld [vmem:[%s1322_s0 + $0xf0] sm:$0xff]  ;;  %v91_v32 = vld [vmem:[%s1322_s0 + $0xf8] sm:$0xff] }
  0x10   :  { %37 = vst.msk [vmem:[#allocation2 + $0x1b0] sm:$0xff] %vm8_vm0, %v973_v0  ;;  %94 = vst.msk [vmem:[#allocation2 + $0x3a] sm:$0xff] %vm8_vm0, %v61_v2  ;;  %v126_v33 = vld [vmem:[#allocation2 + $0x8] sm:$0xff]  ;;  %v128_v41 = vld [vmem:[#allocation2 + $0x20] sm:$0xff] }
  0x11   :  { %41 = vst.msk [vmem:[#allocation2 + $0x12] sm:$0x1] %vm40_vm3, %v973_v0  ;;  %42 = vst.msk [vmem:[#allocation2 + $0x2a] sm:$0x1] %vm40_vm3, %v973_v0  ;;  %v164_v34 = vmul.f32 0.125, %v126_v33  ;;  %v202_v35 = vld [vmem:[#allocation2 + $0x9] sm:$0xff] }
  0x12   :  { %43 = vst.msk [vmem:[#allocation2 + $0x42] sm:$0x1] %vm40_vm3, %v973_v0  ;;  %44 = vst.msk [vmem:[#allocation2 + $0x5a] sm:$0x1] %vm40_vm3, %v973_v0  ;;  %v316_v36 = vld [vmem:[#allocation2 + $0xa] sm:$0xff]  ;;  %v240_v38 = vmul.f32 0.375, %v202_v35 }
  0x13   :  { %45 = vst.msk [vmem:[#allocation2 + $0x72] sm:$0x1] %vm40_vm3, %v973_v0  ;;  %46 = vst.msk [vmem:[#allocation2 + $0x8a] sm:$0x1] %vm40_vm3, %v973_v0  ;;  %v354_v39 = vmul.f32 0.375, %v316_v36  ;;  %v204_v42 = vld [vmem:[#allocation2 + $0x21] sm:$0xff] }
  0x14   :  { %47 = vst.msk [vmem:[#allocation2 + $0xa2] sm:$0x1] %vm40_vm3, %v973_v0  ;;  %48 = vst.msk [vmem:[#allocation2 + $0xba] sm:$0x1] %vm40_vm3, %v973_v0  ;;  %v318_v43 = vld [vmem:[#allocation2 + $0x22] sm:$0xff]  ;;  %v166_v44 = vmul.f32 0.125, %v128_v41  ;;  %v278_v50 = vadd.f32 %v240_v38, %v164_v34 }
  0x15   :  { %49 = vst.msk [vmem:[#allocation2 + $0xd2] sm:$0x1] %vm40_vm3, %v973_v0  ;;  %50 = vst.msk [vmem:[#allocation2 + $0xea] sm:$0x1] %vm40_vm3, %v973_v0  ;;  %v242_v45 = vmul.f32 0.375, %v204_v42  ;;  %v356_v46 = vmul.f32 0.375, %v318_v43 }
  0x16   :  { %51 = vst.msk [vmem:[#allocation2 + $0x102] sm:$0x1] %vm40_vm3, %v973_v0  ;;  %52 = vst.msk [vmem:[#allocation2 + $0x11a] sm:$0x1] %vm40_vm3, %v973_v0  ;;  %v125_v48 = vld [vmem:[#allocation2] sm:$0xff]  ;;  %v127_v56 = vld [vmem:[#allocation2 + $0x18] sm:$0xff] }
  0x17   :  { %53 = vst.msk [vmem:[#allocation2 + $0x132] sm:$0x1] %vm40_vm3, %v973_v0  ;;  %54 = vst.msk [vmem:[#allocation2 + $0x14a] sm:$0x1] %vm40_vm3, %v973_v0  ;;  %v201_v49 = vld [vmem:[#allocation2 + $0x1] sm:$0xff]  ;;  %v163_v52 = vmul.f32 0.125, %v125_v48  ;;  %v280_v57 = vadd.f32 %v242_v45, %v166_v44 }
  0x18   :  { %55 = vst.msk [vmem:[#allocation2 + $0x162] sm:$0x1] %vm40_vm3, %v973_v0  ;;  %56 = vst.msk [vmem:[#allocation2 + $0x17a] sm:$0x1] %vm40_vm3, %v973_v0  ;;  %v430_v37 = vld [vmem:[#allocation2 + $0xb] sm:$0xff]  ;;  %v432_v47 = vld [vmem:[#allocation2 + $0x23] sm:$0xff] }
  0x19   :  { %57 = vst.msk [vmem:[#allocation2 + $0x192] sm:$0x1] %vm40_vm3, %v973_v0  ;;  %58 = vst.msk [vmem:[#allocation2 + $0x1aa] sm:$0x1] %vm40_vm3, %v973_v0  ;;  %v468_v40 = vmul.f32 0.125, %v430_v37  ;;  %v470_v51 = vmul.f32 0.125, %v432_v47 }
  0x1a   :  { %59 = vst.msk [vmem:[#allocation2 + $0x1c2] sm:$0x1] %vm40_vm3, %v973_v0  ;;  %v239_v53 = vmul.f32 0.375, %v201_v49  ;;  %v315_v54 = vld [vmem:[#allocation2 + $0x2] sm:$0xff]  ;;  %v165_v60 = vmul.f32 0.125, %v127_v56  ;;  %v203_v61 = vld [vmem:[#allocation2 + $0x19] sm:$0xff]  ;;  %v392_v0 = vadd.f32 %v354_v39, %v278_v50 }
  0x1b   :  { %95 = vst.msk [vmem:[#allocation2 + $0x4a] sm:$0xff] %vm8_vm0, %v62_v3  ;;  %96 = vst.msk [vmem:[#allocation2 + $0x52] sm:$0xff] %vm8_vm0, %v63_v4  ;;  %v429_v55 = vld [vmem:[#allocation2 + $0x3] sm:$0xff]  ;;  %v353_v58 = vmul.f32 0.375, %v315_v54  ;;  %v317_v62 = vld [vmem:[#allocation2 + $0x1a] sm:$0xff]  ;;  %v241_v2 = vmul.f32 0.375, %v203_v61 }
  0x1c   :  { %97 = vst.msk [vmem:[#allocation2 + $0x62] sm:$0xff] %vm8_vm0, %v64_v5  ;;  %98 = vst.msk [vmem:[#allocation2 + $0x6a] sm:$0xff] %vm8_vm0, %v65_v6  ;;  %v467_v59 = vmul.f32 0.125, %v429_v55  ;;  %v431_v63 = vld [vmem:[#allocation2 + $0x1b] sm:$0xff]  ;;  %v277_v1 = vadd.f32 %v239_v53, %v163_v52  ;;  %v355_v3 = vmul.f32 0.375, %v317_v62  ;;  %v129_v4 = vld [vmem:[#allocation2 + $0x30] sm:$0xff] }
  0x1d   :  { %99 = vst.msk [vmem:[#allocation2 + $0x7a] sm:$0xff] %vm8_vm0, %v66_v7  ;;  %100 = vst.msk [vmem:[#allocation2 + $0x82] sm:$0xff] %vm8_vm0, %v67_v8  ;;  %v205_v5 = vld [vmem:[#allocation2 + $0x31] sm:$0xff]  ;;  %v394_v7 = vadd.f32 %v356_v46, %v280_v57  ;;  %v469_v8 = vmul.f32 0.125, %v431_v63 }
  0x1e   :  { %101 = vst.msk [vmem:[#allocation2 + $0x92] sm:$0xff] %vm8_vm0, %v68_v9  ;;  %102 = vst.msk [vmem:[#allocation2 + $0x9a] sm:$0xff] %vm8_vm0, %v69_v10  ;;  %v319_v6 = vld [vmem:[#allocation2 + $0x32] sm:$0xff]  ;;  %v167_v9 = vmul.f32 0.125, %v129_v4  ;;  %v243_v10 = vmul.f32 0.375, %v205_v5 }
  0x1f   :  { %103 = vst.msk [vmem:[#allocation2 + $0xaa] sm:$0xff] %vm8_vm0, %v70_v11  ;;  %104 = vst.msk [vmem:[#allocation2 + $0xb2] sm:$0xff] %vm8_vm0, %v71_v12  ;;  %v433_v11 = vld [vmem:[#allocation2 + $0x33] sm:$0xff] }
  0x20   :  { %105 = vst.msk [vmem:[#allocation2 + $0xc2] sm:$0xff] %vm8_vm0, %v72_v13  ;;  %106 = vst.msk [vmem:[#allocation2 + $0xca] sm:$0xff] %vm8_vm0, %v73_v14  ;;  %v130_v12 = vld [vmem:[#allocation2 + $0x38] sm:$0xff]  ;;  %v506_v14 = vadd.f32 %v468_v40, %v392_v0 }
  0x21   :  { %107 = vst.msk [vmem:[#allocation2 + $0xda] sm:$0xff] %vm8_vm0, %v74_v15  ;;  %108 = vst.msk [vmem:[#allocation2 + $0xe2] sm:$0xff] %vm8_vm0, %v75_v16  ;;  %v206_v13 = vld [vmem:[#allocation2 + $0x39] sm:$0xff]  ;;  %v391_v15 = vadd.f32 %v353_v58, %v277_v1  ;;  %v279_v16 = vadd.f32 %v241_v2, %v165_v60 }
  0x22   :  { %109 = vst.msk [vmem:[#allocation2 + $0xf2] sm:$0xff] %vm8_vm0, %v76_v17  ;;  %110 = vst.msk [vmem:[#allocation2 + $0xfa] sm:$0xff] %vm8_vm0, %v77_v18  ;;  %v357_v17 = vmul.f32 0.375, %v319_v6  ;;  %v320_v18 = vld [vmem:[#allocation2 + $0x3a] sm:$0xff]  ;;  %v208_v33 = vld [vmem:[#allocation2 + $0x51] sm:$0xff] }
  0x23   :  { %111 = vst.msk [vmem:[#allocation2 + $0x10a] sm:$0xff] %vm8_vm0, %v78_v19  ;;  %112 = vst.msk [vmem:[#allocation2 + $0x112] sm:$0xff] %vm8_vm0, %v79_v20  ;;  %v434_v19 = vld [vmem:[#allocation2 + $0x3b] sm:$0xff]  ;;  %v131_v20 = vld [vmem:[#allocation2 + $0x48] sm:$0xff]  ;;  %v246_v50 = vmul.f32 0.375, %v208_v33 }
  0x24   :  { %113 = vst.msk [vmem:[#allocation2 + $0x122] sm:$0xff] %vm8_vm0, %v80_v21  ;;  %114 = vst.msk [vmem:[#allocation2 + $0x12a] sm:$0xff] %vm8_vm0, %v81_v22  ;;  %v508_v21 = vadd.f32 %v470_v51, %v394_v7  ;;  %v281_v22 = vadd.f32 %v243_v10, %v167_v9  ;;  %v472_v35 = vmul.f32 0.125, %v434_v19  ;;  %v169_v36 = vmul.f32 0.125, %v131_v20  ;;  %v322_v38 = vld [vmem:[#allocation2 + $0x52] sm:$0xff]  ;;  %v133_v40 = vld [vmem:[#allocation2 + $0x60] sm:$0xff] }
  0x25   :  { %115 = vst.msk [vmem:[#allocation2 + $0x13a] sm:$0xff] %vm8_vm0, %v82_v23  ;;  %116 = vst.msk [vmem:[#allocation2 + $0x142] sm:$0xff] %vm8_vm0, %v83_v24  ;;  %v471_v23 = vmul.f32 0.125, %v433_v11  ;;  %v168_v24 = vmul.f32 0.125, %v130_v12  ;;  %v436_v39 = vld [vmem:[#allocation2 + $0x53] sm:$0xff]  ;;  %v209_v45 = vld [vmem:[#allocation2 + $0x61] sm:$0xff] }
  0x26   :  { %117 = vst.msk [vmem:[#allocation2 + $0x152] sm:$0xff] %vm8_vm0, %v84_v25  ;;  %118 = vst.msk [vmem:[#allocation2 + $0x15a] sm:$0xff] %vm8_vm0, %v85_v26  ;;  %v207_v25 = vld [vmem:[#allocation2 + $0x49] sm:$0xff]  ;;  %v395_v34 = vadd.f32 %v357_v17, %v281_v22  ;;  %v360_v55 = vmul.f32 0.375, %v322_v38  ;;  %v474_v56 = vmul.f32 0.125, %v436_v39  ;;  %v171_v57 = vmul.f32 0.125, %v133_v40 }
  0x27   :  { %119 = vst.msk [vmem:[#allocation2 + $0x16a] sm:$0xff] %vm8_vm0, %v86_v27  ;;  %120 = vst.msk [vmem:[#allocation2 + $0x172] sm:$0xff] %vm8_vm0, %v87_v28  ;;  %v321_v26 = vld [vmem:[#allocation2 + $0x4a] sm:$0xff]  ;;  %v505_v28 = vadd.f32 %v467_v59, %v391_v15  ;;  %v245_v37 = vmul.f32 0.375, %v207_v25  ;;  %v323_v46 = vld [vmem:[#allocation2 + $0x62] sm:$0xff]  ;;  %v247_v61 = vmul.f32 0.375, %v209_v45 }
  0x28   :  { %121 = vst.msk [vmem:[#allocation2 + $0x182] sm:$0xff] %vm8_vm0, %v88_v29  ;;  %122 = vst.msk [vmem:[#allocation2 + $0x18a] sm:$0xff] %vm8_vm0, %v89_v30  ;;  %v435_v27 = vld [vmem:[#allocation2 + $0x4b] sm:$0xff]  ;;  %v393_v29 = vadd.f32 %v355_v3, %v279_v16  ;;  %v244_v30 = vmul.f32 0.375, %v206_v13  ;;  %v359_v43 = vmul.f32 0.375, %v321_v26  ;;  %v509_v47 = vadd.f32 %v471_v23, %v395_v34  ;;  %v437_v51 = vld [vmem:[#allocation2 + $0x63] sm:$0xff] }
  0x29   :  { %123 = vst.msk [vmem:[#allocation2 + $0x19a] sm:$0xff] %vm8_vm0, %v90_v31  ;;  %124 = vst.msk [vmem:[#allocation2 + $0x1a2] sm:$0xff] %vm8_vm0, %v91_v32  ;;  %v358_v31 = vmul.f32 0.375, %v320_v18  ;;  %v132_v32 = vld [vmem:[#allocation2 + $0x50] sm:$0xff]  ;;  %v473_v44 = vmul.f32 0.125, %v435_v27  ;;  %v283_v48 = vadd.f32 %v245_v37, %v169_v36  ;;  %v134_v52 = vld [vmem:[#allocation2 + $0x68] sm:$0xff]  ;;  %v285_v10 = vadd.f32 %v247_v61, %v171_v57 }
  0x2a   :  { %544 = vst.msk [vmem:[#allocation3 + $0x8] sm:$0xff] %vm8_vm0, %v506_v14  ;;  %546 = vst.msk [vmem:[#allocation3 + $0x18] sm:$0xff] %vm8_vm0, %v508_v21  ;;  %v507_v41 = vadd.f32 %v469_v8, %v393_v29  ;;  %v282_v42 = vadd.f32 %v244_v30, %v168_v24  ;;  %v170_v49 = vmul.f32 0.125, %v132_v32  ;;  %v210_v53 = vld [vmem:[#allocation2 + $0x69] sm:$0xff]  ;;  %v361_v62 = vmul.f32 0.375, %v323_v46  ;;  %v135_v0 = vld [vmem:[#allocation2 + $0x78] sm:$0xff] }
  0x2b   :  { %543 = vst.msk [vmem:[#allocation3] sm:$0xff] %vm8_vm0, %v505_v28  ;;  %v324_v58 = vld [vmem:[#allocation2 + $0x6a] sm:$0xff]  ;;  %547 = vst.msk [vmem:[#allocation3 + $0x20] sm:$0xff] %vm8_vm0, %v509_v47  ;;  %v397_v59 = vadd.f32 %v359_v43, %v283_v48  ;;  %v211_v1 = vld [vmem:[#allocation2 + $0x79] sm:$0xff]  ;;  %v475_v3 = vmul.f32 0.125, %v437_v51  ;;  %v172_v4 = vmul.f32 0.125, %v134_v52 }
  0x2c   :  { %545 = vst.msk [vmem:[#allocation3 + $0x10] sm:$0xff] %vm8_vm0, %v507_v41  ;;  %v396_v54 = vadd.f32 %v358_v31, %v282_v42  ;;  %v284_v60 = vadd.f32 %v246_v50, %v170_v49  ;;  %v438_v63 = vld [vmem:[#allocation2 + $0x6b] sm:$0xff]  ;;  %v248_v5 = vmul.f32 0.375, %v210_v53  ;;  %v325_v6 = vld [vmem:[#allocation2 + $0x7a] sm:$0xff]  ;;  %v362_v11 = vmul.f32 0.375, %v324_v58  ;;  %v326_v18 = vld [vmem:[#allocation2 + $0x82] sm:$0xff] }
  0x2d   :  { %v439_v7 = vld [vmem:[#allocation2 + $0x7b] sm:$0xff]  ;;  %v511_v8 = vadd.f32 %v473_v44, %v397_v59  ;;  %v476_v15 = vmul.f32 0.125, %v438_v63  ;;  %v173_v16 = vmul.f32 0.125, %v135_v0  ;;  %v249_v17 = vmul.f32 0.375, %v211_v1  ;;  %v440_v19 = vld [vmem:[#allocation2 + $0x83] sm:$0xff]  ;;  %v137_v20 = vld [vmem:[#allocation2 + $0x90] sm:$0xff] }
  0x2e   :  { %v510_v2 = vadd.f32 %v472_v35, %v396_v54  ;;  %v398_v9 = vadd.f32 %v360_v55, %v284_v60  ;;  %v136_v12 = vld [vmem:[#allocation2 + $0x80] sm:$0xff]  ;;  %v286_v14 = vadd.f32 %v248_v5, %v172_v4  ;;  %v399_v22 = vadd.f32 %v361_v62, %v285_v10  ;;  %v213_v25 = vld [vmem:[#allocation2 + $0x91] sm:$0xff]  ;;  %v139_v44 = vld [vmem:[#allocation2 + $0xa8] sm:$0xff] }
  0x2f   :  { %v212_v13 = vld [vmem:[#allocation2 + $0x81] sm:$0xff]  ;;  %549 = vst.msk [vmem:[#allocation3 + $0x30] sm:$0xff] %vm8_vm0, %v511_v8  ;;  %v363_v23 = vmul.f32 0.375, %v325_v6  ;;  %v477_v24 = vmul.f32 0.125, %v439_v7  ;;  %v327_v26 = vld [vmem:[#allocation2 + $0x92] sm:$0xff]  ;;  %v287_v28 = vadd.f32 %v249_v17, %v173_v16  ;;  %v174_v29 = vmul.f32 0.125, %v136_v12 }
  0x30   :  { %548 = vst.msk [vmem:[#allocation3 + $0x28] sm:$0xff] %vm8_vm0, %v510_v2  ;;  %v512_v21 = vadd.f32 %v474_v56, %v398_v9  ;;  %v400_v27 = vadd.f32 %v362_v11, %v286_v14  ;;  %v250_v30 = vmul.f32 0.375, %v212_v13  ;;  %v441_v31 = vld [vmem:[#allocation2 + $0x93] sm:$0xff]  ;;  %v513_v34 = vadd.f32 %v475_v3, %v399_v22  ;;  %v442_v43 = vld [vmem:[#allocation2 + $0x9b] sm:$0xff]  ;;  %v215_v45 = vld [vmem:[#allocation2 + $0xa9] sm:$0xff] }
  0x31   :  { %v138_v32 = vld [vmem:[#allocation2 + $0x98] sm:$0xff]  ;;  %v364_v35 = vmul.f32 0.375, %v326_v18  ;;  %v478_v36 = vmul.f32 0.125, %v440_v19  ;;  %v175_v37 = vmul.f32 0.125, %v137_v20  ;;  %v401_v40 = vadd.f32 %v363_v23, %v287_v28  ;;  %v329_v50 = vld [vmem:[#allocation2 + $0xaa] sm:$0xff]  ;;  %v141_v0 = vld [vmem:[#allocation2 + $0xc0] sm:$0xff] }
  0x32   :  { %v214_v33 = vld [vmem:[#allocation2 + $0x99] sm:$0xff]  ;;  %550 = vst.msk [vmem:[#allocation3 + $0x38] sm:$0xff] %vm8_vm0, %v512_v21  ;;  %v514_v39 = vadd.f32 %v476_v15, %v400_v27  ;;  %v288_v41 = vadd.f32 %v250_v30, %v174_v29  ;;  %v251_v42 = vmul.f32 0.375, %v213_v25  ;;  %551 = vst.msk [vmem:[#allocation3 + $0x40] sm:$0xff] %vm8_vm0, %v513_v34  ;;  %v365_v46 = vmul.f32 0.375, %v327_v26  ;;  %v443_v51 = vld [vmem:[#allocation2 + $0xab] sm:$0xff] }
  0x33   :  { %v328_v38 = vld [vmem:[#allocation2 + $0x9a] sm:$0xff]  ;;  %v479_v47 = vmul.f32 0.125, %v441_v31  ;;  %v176_v48 = vmul.f32 0.125, %v138_v32  ;;  %v252_v49 = vmul.f32 0.375, %v214_v33  ;;  %v515_v52 = vadd.f32 %v477_v24, %v401_v40  ;;  %v140_v56 = vld [vmem:[#allocation2 + $0xb0] sm:$0xff]  ;;  %v331_v6 = vld [vmem:[#allocation2 + $0xc2] sm:$0xff] }
  0x34   :  { %552 = vst.msk [vmem:[#allocation3 + $0x48] sm:$0xff] %vm8_vm0, %v514_v39  ;;  %v402_v53 = vadd.f32 %v364_v35, %v288_v41  ;;  %v289_v54 = vadd.f32 %v251_v42, %v175_v37  ;;  %v366_v55 = vmul.f32 0.375, %v328_v38  ;;  %v216_v57 = vld [vmem:[#allocation2 + $0xb1] sm:$0xff]  ;;  %v480_v59 = vmul.f32 0.125, %v442_v43  ;;  %v217_v5 = vld [vmem:[#allocation2 + $0xc1] sm:$0xff]  ;;  %v218_v13 = vld [vmem:[#allocation2 + $0xc9] sm:$0xff] }
  0x35   :  { %v290_v58 = vadd.f32 %v252_v49, %v176_v48  ;;  %v177_v60 = vmul.f32 0.125, %v139_v44  ;;  %v253_v61 = vmul.f32 0.375, %v215_v45  ;;  %v330_v62 = vld [vmem:[#allocation2 + $0xb2] sm:$0xff]  ;;  %553 = vst.msk [vmem:[#allocation3 + $0x50] sm:$0xff] %vm8_vm0, %v515_v52  ;;  %v367_v3 = vmul.f32 0.375, %v329_v50  ;;  %v445_v11 = vld [vmem:[#allocation2 + $0xc3] sm:$0xff] }
  0x36   :  { %v444_v63 = vld [vmem:[#allocation2 + $0xb3] sm:$0xff]  ;;  %v516_v1 = vadd.f32 %v478_v36, %v402_v53  ;;  %v403_v2 = vadd.f32 %v365_v46, %v289_v54  ;;  %v481_v4 = vmul.f32 0.125, %v443_v51  ;;  %v178_v9 = vmul.f32 0.125, %v140_v56  ;;  %v142_v12 = vld [vmem:[#allocation2 + $0xc8] sm:$0xff]  ;;  %v447_v31 = vld [vmem:[#allocation2 + $0xdb] sm:$0xff] }
  0x37   :  { %v404_v7 = vadd.f32 %v366_v55, %v290_v58  ;;  %v291_v8 = vadd.f32 %v253_v61, %v177_v60  ;;  %v254_v10 = vmul.f32 0.375, %v216_v57  ;;  %v368_v15 = vmul.f32 0.375, %v330_v62  ;;  %v332_v18 = vld [vmem:[#allocation2 + $0xca] sm:$0xff]  ;;  %v143_v24 = vld [vmem:[#allocation2 + $0xd8] sm:$0xff]  ;;  %v144_v36 = vld [vmem:[#allocation2 + $0xe0] sm:$0xff] }
  0x38   :  { %554 = vst.msk [vmem:[#allocation3 + $0x58] sm:$0xff] %vm8_vm0, %v516_v1  ;;  %v517_v14 = vadd.f32 %v479_v47, %v403_v2  ;;  %v482_v16 = vmul.f32 0.125, %v444_v63  ;;  %v179_v17 = vmul.f32 0.125, %v141_v0  ;;  %v255_v22 = vmul.f32 0.375, %v217_v5  ;;  %v446_v23 = vld [vmem:[#allocation2 + $0xcb] sm:$0xff]  ;;  %v219_v25 = vld [vmem:[#allocation2 + $0xd9] sm:$0xff] }
  0x39   :  { %v518_v19 = vadd.f32 %v480_v59, %v404_v7  ;;  %v405_v20 = vadd.f32 %v367_v3, %v291_v8  ;;  %v292_v21 = vadd.f32 %v254_v10, %v178_v9  ;;  %v369_v26 = vmul.f32 0.375, %v331_v6  ;;  %v333_v30 = vld [vmem:[#allocation2 + $0xda] sm:$0xff]  ;;  %v334_v42 = vld [vmem:[#allocation2 + $0xe2] sm:$0xff]  ;;  %v145_v44 = vld [vmem:[#allocation2 + $0xf0] sm:$0xff] }
  0x3a   :  { %555 = vst.msk [vmem:[#allocation3 + $0x60] sm:$0xff] %vm8_vm0, %v517_v14  ;;  %v483_v27 = vmul.f32 0.125, %v445_v11  ;;  %v180_v28 = vmul.f32 0.125, %v142_v12  ;;  %v256_v29 = vmul.f32 0.375, %v218_v13  ;;  %v293_v34 = vadd.f32 %v255_v22, %v179_v17  ;;  %v220_v37 = vld [vmem:[#allocation2 + $0xe1] sm:$0xff]  ;;  %v221_v49 = vld [vmem:[#allocation2 + $0xf1] sm:$0xff] }
  0x3b   :  { %556 = vst.msk [vmem:[#allocation3 + $0x68] sm:$0xff] %vm8_vm0, %v518_v19  ;;  %v519_v32 = vadd.f32 %v481_v4, %v405_v20  ;;  %v406_v33 = vadd.f32 %v368_v15, %v292_v21  ;;  %v370_v35 = vmul.f32 0.375, %v332_v18  ;;  %v484_v39 = vmul.f32 0.125, %v446_v23  ;;  %v448_v43 = vld [vmem:[#allocation2 + $0xe3] sm:$0xff]  ;;  %v335_v50 = vld [vmem:[#allocation2 + $0xf2] sm:$0xff]  ;;  %v336_v62 = vld [vmem:[#allocation2 + $0xfa] sm:$0xff] }
  0x3c   :  { %v294_v38 = vadd.f32 %v256_v29, %v180_v28  ;;  %v181_v40 = vmul.f32 0.125, %v143_v24  ;;  %v257_v41 = vmul.f32 0.375, %v219_v25  ;;  %v407_v46 = vadd.f32 %v369_v26, %v293_v34  ;;  %v449_v55 = vld [vmem:[#allocation2 + $0xf3] sm:$0xff]  ;;  %v450_v3 = vld [vmem:[#allocation2 + $0xfb] sm:$0xff]  ;;  %v147_v4 = vld [vmem:[#allocation2 + $0x108] sm:$0xff] }
  0x3d   :  { %557 = vst.msk [vmem:[#allocation3 + $0x70] sm:$0xff] %vm8_vm0, %v519_v32  ;;  %v520_v45 = vadd.f32 %v482_v16, %v406_v33  ;;  %v371_v47 = vmul.f32 0.375, %v333_v30  ;;  %v485_v48 = vmul.f32 0.125, %v447_v31  ;;  %v182_v53 = vmul.f32 0.125, %v144_v36  ;;  %v146_v56 = vld [vmem:[#allocation2 + $0xf8] sm:$0xff]  ;;  %v223_v5 = vld [vmem:[#allocation2 + $0x109] sm:$0xff] }
  0x3e   :  { %v408_v51 = vadd.f32 %v370_v35, %v294_v38  ;;  %v295_v52 = vadd.f32 %v257_v41, %v181_v40  ;;  %v258_v54 = vmul.f32 0.375, %v220_v37  ;;  %v222_v57 = vld [vmem:[#allocation2 + $0xf9] sm:$0xff]  ;;  %v521_v58 = vadd.f32 %v483_v27, %v407_v46  ;;  %v337_v10 = vld [vmem:[#allocation2 + $0x10a] sm:$0xff]  ;;  %v225_v29 = vld [vmem:[#allocation2 + $0x121] sm:$0xff] }
  0x3f   :  { %558 = vst.msk [vmem:[#allocation3 + $0x78] sm:$0xff] %vm8_vm0, %v520_v45  ;;  %v372_v59 = vmul.f32 0.375, %v334_v42  ;;  %v486_v60 = vmul.f32 0.125, %v448_v43  ;;  %v183_v61 = vmul.f32 0.125, %v145_v44  ;;  %v259_v2 = vmul.f32 0.375, %v221_v49  ;;  %v451_v11 = vld [vmem:[#allocation2 + $0x10b] sm:$0xff] }
  0x40   :  { %v522_v63 = vadd.f32 %v484_v39, %v408_v51  ;;  %v409_v0 = vadd.f32 %v371_v47, %v295_v52  ;;  %v296_v1 = vadd.f32 %v258_v54, %v182_v53  ;;  %559 = vst.msk [vmem:[#allocation3 + $0x80] sm:$0xff] %vm8_vm0, %v521_v58  ;;  %v373_v6 = vmul.f32 0.375, %v335_v50  ;;  %v148_v16 = vld [vmem:[#allocation2 + $0x110] sm:$0xff]  ;;  %v149_v24 = vld [vmem:[#allocation2 + $0x120] sm:$0xff]  ;;  %v150_v36 = vld [vmem:[#allocation2 + $0x128] sm:$0xff] }
  0x41   :  { %v487_v7 = vmul.f32 0.125, %v449_v55  ;;  %v184_v8 = vmul.f32 0.125, %v146_v56  ;;  %v260_v9 = vmul.f32 0.375, %v222_v57  ;;  %v297_v14 = vadd.f32 %v259_v2, %v183_v61  ;;  %v224_v17 = vld [vmem:[#allocation2 + $0x111] sm:$0xff]  ;;  %v339_v30 = vld [vmem:[#allocation2 + $0x122] sm:$0xff]  ;;  %v227_v49 = vld [vmem:[#allocation2 + $0x139] sm:$0xff] }
  0x42   :  { %560 = vst.msk [vmem:[#allocation3 + $0x88] sm:$0xff] %vm8_vm0, %v522_v63  ;;  %v523_v12 = vadd.f32 %v485_v48, %v409_v0  ;;  %v410_v13 = vadd.f32 %v372_v59, %v296_v1  ;;  %v374_v15 = vmul.f32 0.375, %v336_v62  ;;  %v488_v19 = vmul.f32 0.125, %v450_v3  ;;  %v338_v22 = vld [vmem:[#allocation2 + $0x112] sm:$0xff]  ;;  %v453_v35 = vld [vmem:[#allocation2 + $0x123] sm:$0xff]  ;;  %v341_v54 = vld [vmem:[#allocation2 + $0x13a] sm:$0xff] }
  0x43   :  { %v298_v18 = vadd.f32 %v260_v9, %v184_v8  ;;  %v185_v20 = vmul.f32 0.125, %v147_v4  ;;  %v261_v21 = vmul.f32 0.375, %v223_v5  ;;  %v452_v23 = vld [vmem:[#allocation2 + $0x113] sm:$0xff]  ;;  %v411_v26 = vadd.f32 %v373_v6, %v297_v14  ;;  %v226_v37 = vld [vmem:[#allocation2 + $0x129] sm:$0xff]  ;;  %v455_v55 = vld [vmem:[#allocation2 + $0x13b] sm:$0xff] }
  0x44   :  { %561 = vst.msk [vmem:[#allocation3 + $0x90] sm:$0xff] %vm8_vm0, %v523_v12  ;;  %v524_v25 = vadd.f32 %v486_v60, %v410_v13  ;;  %v375_v27 = vmul.f32 0.375, %v337_v10  ;;  %v489_v28 = vmul.f32 0.125, %v451_v11  ;;  %v186_v33 = vmul.f32 0.125, %v148_v16  ;;  %v340_v42 = vld [vmem:[#allocation2 + $0x12a] sm:$0xff]  ;;  %v151_v48 = vld [vmem:[#allocation2 + $0x138] sm:$0xff] }
  0x45   :  { %v412_v31 = vadd.f32 %v374_v15, %v298_v18  ;;  %v299_v32 = vadd.f32 %v261_v21, %v185_v20  ;;  %v262_v34 = vmul.f32 0.375, %v224_v17  ;;  %v525_v38 = vadd.f32 %v487_v7, %v411_v26  ;;  %v454_v47 = vld [vmem:[#allocation2 + $0x12b] sm:$0xff]  ;;  %v152_v60 = vld [vmem:[#allocation2 + $0x140] sm:$0xff]  ;;  %v457_v15 = vld [vmem:[#allocation2 + $0x153] sm:$0xff] }
  0x46   :  { %562 = vst.msk [vmem:[#allocation3 + $0x98] sm:$0xff] %vm8_vm0, %v524_v25  ;;  %v376_v39 = vmul.f32 0.375, %v338_v22  ;;  %v490_v40 = vmul.f32 0.125, %v452_v23  ;;  %v187_v41 = vmul.f32 0.125, %v149_v24  ;;  %v263_v46 = vmul.f32 0.375, %v225_v29  ;;  %v228_v61 = vld [vmem:[#allocation2 + $0x141] sm:$0xff] }
  0x47   :  { %v526_v43 = vadd.f32 %v488_v19, %v412_v31  ;;  %v413_v44 = vadd.f32 %v375_v27, %v299_v32  ;;  %v300_v45 = vadd.f32 %v262_v34, %v186_v33  ;;  %563 = vst.msk [vmem:[#allocation3 + $0xa0] sm:$0xff] %vm8_vm0, %v525_v38  ;;  %v377_v50 = vmul.f32 0.375, %v339_v30  ;;  %v342_v2 = vld [vmem:[#allocation2 + $0x142] sm:$0xff]  ;;  %v153_v4 = vld [vmem:[#allocation2 + $0x150] sm:$0xff]  ;;  %v154_v16 = vld [vmem:[#allocation2 + $0x158] sm:$0xff] }
  0x48   :  { %v491_v51 = vmul.f32 0.125, %v453_v35  ;;  %v188_v52 = vmul.f32 0.125, %v150_v36  ;;  %v264_v53 = vmul.f32 0.375, %v226_v37  ;;  %v301_v58 = vadd.f32 %v263_v46, %v187_v41  ;;  %v456_v3 = vld [vmem:[#allocation2 + $0x143] sm:$0xff]  ;;  %v229_v9 = vld [vmem:[#allocation2 + $0x151] sm:$0xff]  ;;  %v230_v17 = vld [vmem:[#allocation2 + $0x159] sm:$0xff] }
  0x49   :  { %564 = vst.msk [vmem:[#allocation3 + $0xa8] sm:$0xff] %vm8_vm0, %v526_v43  ;;  %v527_v56 = vadd.f32 %v489_v28, %v413_v44  ;;  %v414_v57 = vadd.f32 %v376_v39, %v300_v45  ;;  %v378_v59 = vmul.f32 0.375, %v340_v42  ;;  %v492_v63 = vmul.f32 0.125, %v454_v47  ;;  %v343_v10 = vld [vmem:[#allocation2 + $0x152] sm:$0xff]  ;;  %v344_v22 = vld [vmem:[#allocation2 + $0x15a] sm:$0xff]  ;;  %v155_v28 = vld [vmem:[#allocation2 + $0x168] sm:$0xff] }
  0x4a   :  { %v302_v62 = vadd.f32 %v264_v53, %v188_v52  ;;  %v189_v0 = vmul.f32 0.125, %v151_v48  ;;  %v265_v1 = vmul.f32 0.375, %v227_v49  ;;  %v415_v6 = vadd.f32 %v377_v50, %v301_v58  ;;  %v458_v27 = vld [vmem:[#allocation2 + $0x15b] sm:$0xff]  ;;  %v231_v29 = vld [vmem:[#allocation2 + $0x169] sm:$0xff]  ;;  %v232_v41 = vld [vmem:[#allocation2 + $0x171] sm:$0xff] }
  0x4b   :  { %565 = vst.msk [vmem:[#allocation3 + $0xb0] sm:$0xff] %vm8_vm0, %v527_v56  ;;  %v528_v5 = vadd.f32 %v490_v40, %v414_v57  ;;  %v379_v7 = vmul.f32 0.375, %v341_v54  ;;  %v493_v8 = vmul.f32 0.125, %v455_v55  ;;  %v190_v13 = vmul.f32 0.125, %v152_v60  ;;  %v345_v34 = vld [vmem:[#allocation2 + $0x16a] sm:$0xff]  ;;  %v346_v46 = vld [vmem:[#allocation2 + $0x172] sm:$0xff] }
  0x4c   :  { %v416_v11 = vadd.f32 %v378_v59, %v302_v62  ;;  %v303_v12 = vadd.f32 %v265_v1, %v189_v0  ;;  %v266_v14 = vmul.f32 0.375, %v228_v61  ;;  %v529_v18 = vadd.f32 %v491_v51, %v415_v6  ;;  %v459_v35 = vld [vmem:[#allocation2 + $0x16b] sm:$0xff]  ;;  %v460_v47 = vld [vmem:[#allocation2 + $0x173] sm:$0xff]  ;;  %v157_v48 = vld [vmem:[#allocation2 + $0x180] sm:$0xff] }
  0x4d   :  { %566 = vst.msk [vmem:[#allocation3 + $0xb8] sm:$0xff] %vm8_vm0, %v528_v5  ;;  %v380_v19 = vmul.f32 0.375, %v342_v2  ;;  %v494_v20 = vmul.f32 0.125, %v456_v3  ;;  %v191_v21 = vmul.f32 0.125, %v153_v4  ;;  %v267_v26 = vmul.f32 0.375, %v229_v9  ;;  %v156_v40 = vld [vmem:[#allocation2 + $0x170] sm:$0xff] }
  0x4e   :  { %v530_v23 = vadd.f32 %v492_v63, %v416_v11  ;;  %v417_v24 = vadd.f32 %v379_v7, %v303_v12  ;;  %v304_v25 = vadd.f32 %v266_v14, %v190_v13  ;;  %567 = vst.msk [vmem:[#allocation3 + $0xc0] sm:$0xff] %vm8_vm0, %v529_v18  ;;  %v381_v30 = vmul.f32 0.375, %v343_v10  ;;  %v233_v53 = vld [vmem:[#allocation2 + $0x181] sm:$0xff]  ;;  %v234_v61 = vld [vmem:[#allocation2 + $0x189] sm:$0xff]  ;;  %v235_v9 = vld [vmem:[#allocation2 + $0x199] sm:$0xff] }
  0x4f   :  { %v495_v31 = vmul.f32 0.125, %v457_v15  ;;  %v192_v32 = vmul.f32 0.125, %v154_v16  ;;  %v268_v33 = vmul.f32 0.375, %v230_v17  ;;  %v305_v38 = vadd.f32 %v267_v26, %v191_v21  ;;  %v347_v54 = vld [vmem:[#allocation2 + $0x182] sm:$0xff]  ;;  %v348_v2 = vld [vmem:[#allocation2 + $0x18a] sm:$0xff]  ;;  %v349_v14 = vld [vmem:[#allocation2 + $0x19a] sm:$0xff] }
  0x50   :  { %568 = vst.msk [vmem:[#allocation3 + $0xc8] sm:$0xff] %vm8_vm0, %v530_v23  ;;  %v531_v36 = vadd.f32 %v493_v8, %v417_v24  ;;  %v418_v37 = vadd.f32 %v380_v19, %v304_v25  ;;  %v382_v39 = vmul.f32 0.375, %v344_v22  ;;  %v496_v43 = vmul.f32 0.125, %v458_v27  ;;  %v461_v59 = vld [vmem:[#allocation2 + $0x183] sm:$0xff]  ;;  %v462_v7 = vld [vmem:[#allocation2 + $0x18b] sm:$0xff]  ;;  %v159_v8 = vld [vmem:[#allocation2 + $0x198] sm:$0xff] }
  0x51   :  { %v306_v42 = vadd.f32 %v268_v33, %v192_v32  ;;  %v193_v44 = vmul.f32 0.125, %v155_v28  ;;  %v269_v45 = vmul.f32 0.375, %v231_v29  ;;  %v419_v50 = vadd.f32 %v381_v30, %v305_v38  ;;  %v158_v60 = vld [vmem:[#allocation2 + $0x188] sm:$0xff]  ;;  %v463_v15 = vld [vmem:[#allocation2 + $0x19b] sm:$0xff]  ;;  %v161_v28 = vld [vmem:[#allocation2 + $0x1b0] sm:$0xff] }
  0x52   :  { %569 = vst.msk [vmem:[#allocation3 + $0xd0] sm:$0xff] %vm8_vm0, %v531_v36  ;;  %v532_v49 = vadd.f32 %v494_v20, %v418_v37  ;;  %v383_v51 = vmul.f32 0.375, %v345_v34  ;;  %v497_v52 = vmul.f32 0.125, %v459_v35  ;;  %v194_v57 = vmul.f32 0.125, %v156_v40  ;;  %v160_v20 = vld [vmem:[#allocation2 + $0x1a0] sm:$0xff]  ;;  %v237_v33 = vld [vmem:[#allocation2 + $0x1b1] sm:$0xff] }
  0x53   :  { %v420_v55 = vadd.f32 %v382_v39, %v306_v42  ;;  %v307_v56 = vadd.f32 %v269_v45, %v193_v44  ;;  %v270_v58 = vmul.f32 0.375, %v232_v41  ;;  %v533_v62 = vadd.f32 %v495_v31, %v419_v50  ;;  %v236_v21 = vld [vmem:[#allocation2 + $0x1a1] sm:$0xff]  ;;  %v351_v34 = vld [vmem:[#allocation2 + $0x1b2] sm:$0xff] }
  0x54   :  { %570 = vst.msk [vmem:[#allocation3 + $0xd8] sm:$0xff] %vm8_vm0, %v532_v49  ;;  %v384_v63 = vmul.f32 0.375, %v346_v46  ;;  %v498_v0 = vmul.f32 0.125, %v460_v47  ;;  %v195_v1 = vmul.f32 0.125, %v157_v48  ;;  %v271_v6 = vmul.f32 0.375, %v233_v53  ;;  %v350_v26 = vld [vmem:[#allocation2 + $0x1a2] sm:$0xff] }
  0x55   :  { %v534_v3 = vadd.f32 %v496_v43, %v420_v55  ;;  %v421_v4 = vadd.f32 %v383_v51, %v307_v56  ;;  %v308_v5 = vadd.f32 %v270_v58, %v194_v57  ;;  %571 = vst.msk [vmem:[#allocation3 + $0xe0] sm:$0xff] %vm8_vm0, %v533_v62  ;;  %v385_v10 = vmul.f32 0.375, %v347_v54  ;;  %v464_v27 = vld [vmem:[#allocation2 + $0x1a3] sm:$0xff]  ;;  %v465_v39 = vld [vmem:[#allocation2 + $0x1b3] sm:$0xff]  ;;  %v466_v51 = vld [vmem:[#allocation2 + $0x1bb] sm:$0xff] }
  0x56   :  { %v499_v11 = vmul.f32 0.125, %v461_v59  ;;  %v196_v12 = vmul.f32 0.125, %v158_v60  ;;  %v272_v13 = vmul.f32 0.375, %v234_v61  ;;  %v309_v18 = vadd.f32 %v271_v6, %v195_v1  ;;  %v162_v40 = vld [vmem:[#allocation2 + $0x1b8] sm:$0xff]  ;;  %v647_v53 = vld [vmem:[#allocation3 + $0x18] sm:$0xff]  ;;  %v744_v58 = vld [vmem:[#allocation3 + $0x28] sm:$0xff] }
  0x57   :  { %572 = vst.msk [vmem:[#allocation3 + $0xe8] sm:$0xff] %vm8_vm0, %v534_v3  ;;  %v535_v16 = vadd.f32 %v497_v52, %v421_v4  ;;  %v422_v17 = vadd.f32 %v384_v63, %v308_v5  ;;  %v386_v19 = vmul.f32 0.375, %v348_v2  ;;  %v500_v23 = vmul.f32 0.125, %v462_v7  ;;  %v238_v41 = vld [vmem:[#allocation2 + $0x1b9] sm:$0xff]  ;;  %v582_v52 = vld [vmem:[#allocation3 + $0x8] sm:$0xff]  ;;  %v581_v63 = vld [vmem:[#allocation3] sm:$0xff] }
  0x58   :  { %v310_v22 = vadd.f32 %v272_v13, %v196_v12  ;;  %v197_v24 = vmul.f32 0.125, %v159_v8  ;;  %v273_v25 = vmul.f32 0.375, %v235_v9  ;;  %v423_v30 = vadd.f32 %v385_v10, %v309_v18  ;;  %v352_v46 = vld [vmem:[#allocation2 + $0x1ba] sm:$0xff]  ;;  %v743_v6 = vld [vmem:[#allocation3 + $0x20] sm:$0xff] }
  0x59   :  { %573 = vst.msk [vmem:[#allocation3 + $0xf0] sm:$0xff] %vm8_vm0, %v535_v16  ;;  %v536_v29 = vadd.f32 %v498_v0, %v422_v17  ;;  %v387_v31 = vmul.f32 0.375, %v349_v14  ;;  %v501_v32 = vmul.f32 0.125, %v463_v15  ;;  %v198_v37 = vmul.f32 0.125, %v160_v20  ;;  %v646_v0 = vld [vmem:[#allocation3 + $0x10] sm:$0xff]  ;;  %v841_v5 = vld [vmem:[#allocation3 + $0x38] sm:$0xff] }
  0x5a   :  { %v424_v35 = vadd.f32 %v386_v19, %v310_v22  ;;  %v311_v36 = vadd.f32 %v273_v25, %v197_v24  ;;  %v274_v38 = vmul.f32 0.375, %v236_v21  ;;  %v537_v42 = vadd.f32 %v499_v11, %v423_v30  ;;  %v840_v10 = vld [vmem:[#allocation3 + $0x30] sm:$0xff]  ;;  %v842_v15 = vld [vmem:[#allocation3 + $0x40] sm:$0xff]  ;;  %v843_v24 = vld [vmem:[#allocation3 + $0x48] sm:$0xff] }
  0x5b   :  { %574 = vst.msk [vmem:[#allocation3 + $0xf8] sm:$0xff] %vm8_vm0, %v536_v29  ;;  %v388_v43 = vmul.f32 0.375, %v350_v26  ;;  %v502_v44 = vmul.f32 0.125, %v464_v27  ;;  %v199_v45 = vmul.f32 0.125, %v161_v28  ;;  %v275_v50 = vmul.f32 0.375, %v237_v33  ;;  %v844_v33 = vld [vmem:[#allocation3 + $0x50] sm:$0xff] }
  0x5c   :  { %v538_v47 = vadd.f32 %v500_v23, %v424_v35  ;;  %v425_v48 = vadd.f32 %v387_v31, %v311_v36  ;;  %v312_v49 = vadd.f32 %v274_v38, %v198_v37  ;;  %575 = vst.msk [vmem:[#allocation3 + $0x100] sm:$0xff] %vm8_vm0, %v537_v42  ;;  %v389_v54 = vmul.f32 0.375, %v351_v34  ;;  %v845_v38 = vld [vmem:[#allocation3 + $0x58] sm:$0xff] }
  0x5d   :  { %v503_v55 = vmul.f32 0.125, %v465_v39  ;;  %v200_v56 = vmul.f32 0.125, %v162_v40  ;;  %v276_v57 = vmul.f32 0.375, %v238_v41  ;;  %v313_v61 = vadd.f32 %v275_v50, %v199_v45 }
  0x5e   :  { %576 = vst.msk [vmem:[#allocation3 + $0x108] sm:$0xff] %vm8_vm0, %v538_v47  ;;  %v539_v59 = vadd.f32 %v501_v32, %v425_v48  ;;  %v426_v60 = vadd.f32 %v388_v43, %v312_v49  ;;  %v390_v62 = vmul.f32 0.375, %v352_v46  ;;  %v504_v2 = vmul.f32 0.125, %v466_v51  ;;  %v846_v43 = vld [vmem:[#allocation3 + $0x60] sm:$0xff] }
  0x5f   :  { %v314_v1 = vadd.f32 %v276_v57, %v200_v56  ;;  %v614_v3 = vmul.f32 0.5, %v582_v52  ;;  %v679_v4 = vmul.f32 1.5, %v647_v53  ;;  %v427_v8 = vadd.f32 %v389_v54, %v313_v61  ;;  %v847_v52 = vld [vmem:[#allocation3 + $0x68] sm:$0xff]  ;;  %v848_v57 = vld [vmem:[#allocation3 + $0x70] sm:$0xff] }
  0x60   :  { %577 = vst.msk [vmem:[#allocation3 + $0x110] sm:$0xff] %vm8_vm0, %v539_v59  ;;  %v540_v7 = vadd.f32 %v502_v44, %v426_v60  ;;  %v776_v9 = vmul.f32 1.5, %v744_v58  ;;  %v613_v13 = vmul.f32 0.5, %v581_v63  ;;  %v678_v14 = vmul.f32 1.5, %v646_v0 }
  0x61   :  { %v428_v11 = vadd.f32 %v390_v62, %v314_v1  ;;  %v711_v12 = vadd.f32 %v679_v4, %v614_v3  ;;  %v541_v16 = vadd.f32 %v503_v55, %v427_v8  ;;  %v873_v17 = vmul.f32 0.5, %v841_v5 }
  0x62   :  { %578 = vst.msk [vmem:[#allocation3 + $0x118] sm:$0xff] %vm8_vm0, %v540_v7  ;;  %v775_v18 = vmul.f32 1.5, %v743_v6  ;;  %v615_v19 = vmul.f32 0.5, %v646_v0  ;;  %v710_v22 = vadd.f32 %v678_v14, %v613_v13  ;;  %v777_v23 = vmul.f32 1.5, %v840_v10  ;;  %v850_v7 = vld [vmem:[#allocation3 + $0x80] sm:$0xff] }
  0x63   :  { %v542_v20 = vadd.f32 %v504_v2, %v428_v11  ;;  %v808_v21 = vadd.f32 %v776_v9, %v711_v12  ;;  %579 = vst.msk [vmem:[#allocation3 + $0x120] sm:$0xff] %vm8_vm0, %v541_v16  ;;  %v872_v25 = vmul.f32 0.5, %v840_v10  ;;  %v874_v27 = vmul.f32 0.5, %v842_v15  ;;  %v849_v2 = vld [vmem:[#allocation3 + $0x78] sm:$0xff]  ;;  %v851_v12 = vld [vmem:[#allocation3 + $0x88] sm:$0xff] }
  0x64   :  { %v712_v26 = vadd.f32 %v775_v18, %v615_v19  ;;  %v616_v28 = vmul.f32 0.5, %v647_v53  ;;  %v807_v30 = vadd.f32 %v775_v18, %v710_v22  ;;  %v778_v31 = vmul.f32 1.5, %v841_v5 }
  0x65   :  { %580 = vst.msk [vmem:[#allocation3 + $0x128] sm:$0xff] %vm8_vm0, %v542_v20  ;;  %v905_v29 = vadd.f32 %v873_v17, %v808_v21  ;;  %v617_v32 = vmul.f32 0.5, %v743_v6  ;;  %v875_v36 = vmul.f32 0.5, %v843_v24  ;;  %v779_v37 = vmul.f32 1.5, %v842_v15 }
  0x66   :  { %v809_v34 = vadd.f32 %v777_v23, %v712_v26  ;;  %v713_v35 = vadd.f32 %v776_v9, %v616_v28  ;;  %v904_v39 = vadd.f32 %v872_v25, %v807_v30  ;;  %v618_v41 = vmul.f32 0.5, %v744_v58  ;;  %v853_v26 = vld [vmem:[#allocation3 + $0x98] sm:$0xff] }
  0x67   :  { %937 = vst.msk [vmem:[%s1323_s1 + $0x8] sm:$0xff] %vm8_vm0, %v905_v29  ;;  %v714_v40 = vadd.f32 %v777_v23, %v617_v32  ;;  %v780_v42 = vmul.f32 1.5, %v843_v24  ;;  %v876_v46 = vmul.f32 0.5, %v844_v33  ;;  %v716_v47 = vadd.f32 %v872_v25, %v779_v37 }
  0x68   :  { %v906_v44 = vadd.f32 %v874_v27, %v809_v34  ;;  %v810_v45 = vadd.f32 %v778_v31, %v713_v35  ;;  %936 = vst.msk [vmem:[%s1323_s1] sm:$0xff] %vm8_vm0, %v904_v39  ;;  %v715_v49 = vadd.f32 %v778_v31, %v618_v41  ;;  %v877_v50 = vmul.f32 0.5, %v845_v38  ;;  %v854_v31 = vld [vmem:[#allocation3 + $0xa0] sm:$0xff]  ;;  %v856_v41 = vld [vmem:[#allocation3 + $0xb0] sm:$0xff] }
  0x69   :  { %v811_v48 = vadd.f32 %v779_v37, %v714_v40  ;;  %v781_v51 = vmul.f32 1.5, %v844_v33  ;;  %v878_v54 = vmul.f32 0.5, %v846_v43  ;;  %v717_v55 = vadd.f32 %v873_v17, %v780_v42  ;;  %v852_v17 = vld [vmem:[#allocation3 + $0x90] sm:$0xff] }
  0x6a   :  { %938 = vst.msk [vmem:[%s1323_s1 + $0x10] sm:$0xff] %vm8_vm0, %v906_v44  ;;  %v907_v53 = vadd.f32 %v875_v36, %v810_v45  ;;  %v782_v56 = vmul.f32 1.5, %v845_v38  ;;  %v812_v59 = vadd.f32 %v780_v42, %v715_v49  ;;  %v879_v63 = vmul.f32 0.5, %v847_v52 }
  0x6b   :  { %v908_v58 = vadd.f32 %v876_v46, %v811_v48  ;;  %v813_v60 = vadd.f32 %v781_v51, %v716_v47  ;;  %v718_v61 = vadd.f32 %v874_v27, %v781_v51  ;;  %v783_v0 = vmul.f32 1.5, %v846_v43 }
  0x6c   :  { %939 = vst.msk [vmem:[%s1323_s1 + $0x18] sm:$0xff] %vm8_vm0, %v907_v53  ;;  %v814_v62 = vadd.f32 %v782_v56, %v717_v55  ;;  %v719_v1 = vadd.f32 %v875_v36, %v782_v56  ;;  %v909_v3 = vadd.f32 %v877_v50, %v812_v59  ;;  %v880_v5 = vmul.f32 0.5, %v848_v57  ;;  %v855_v36 = vld [vmem:[#allocation3 + $0xa8] sm:$0xff]  ;;  %v858_v55 = vld [vmem:[#allocation3 + $0xc0] sm:$0xff] }
  0x6d   :  { %940 = vst.msk [vmem:[%s1323_s1 + $0x20] sm:$0xff] %vm8_vm0, %v908_v58  ;;  %v910_v4 = vadd.f32 %v878_v54, %v813_v60  ;;  %v784_v6 = vmul.f32 1.5, %v847_v52  ;;  %v815_v9 = vadd.f32 %v783_v0, %v718_v61  ;;  %v720_v10 = vadd.f32 %v876_v46, %v783_v0  ;;  %v859_v60 = vld [vmem:[#allocation3 + $0xc8] sm:$0xff] }
  0x6e   :  { %v911_v8 = vadd.f32 %v879_v63, %v814_v62  ;;  %v785_v11 = vmul.f32 1.5, %v848_v57  ;;  %941 = vst.msk [vmem:[%s1323_s1 + $0x28] sm:$0xff] %vm8_vm0, %v909_v3  ;;  %v881_v14 = vmul.f32 0.5, %v849_v2  ;;  %v786_v16 = vmul.f32 1.5, %v849_v2 }
  0x6f   :  { %942 = vst.msk [vmem:[%s1323_s1 + $0x30] sm:$0xff] %vm8_vm0, %v910_v4  ;;  %v816_v13 = vadd.f32 %v784_v6, %v719_v1  ;;  %v721_v15 = vadd.f32 %v877_v50, %v784_v6  ;;  %v912_v18 = vadd.f32 %v880_v5, %v815_v9  ;;  %v882_v20 = vmul.f32 0.5, %v850_v7  ;;  %v857_v50 = vld [vmem:[#allocation3 + $0xb8] sm:$0xff]  ;;  %v860_v1 = vld [vmem:[#allocation3 + $0xd0] sm:$0xff] }
  0x70   :  { %943 = vst.msk [vmem:[%s1323_s1 + $0x38] sm:$0xff] %vm8_vm0, %v911_v8  ;;  %v817_v19 = vadd.f32 %v785_v11, %v720_v10  ;;  %v722_v21 = vadd.f32 %v878_v54, %v785_v11  ;;  %v883_v24 = vmul.f32 0.5, %v851_v12  ;;  %v787_v25 = vmul.f32 1.5, %v850_v7  ;;  %v861_v10 = vld [vmem:[#allocation3 + $0xd8] sm:$0xff] }
  0x71   :  { %v913_v22 = vadd.f32 %v881_v14, %v816_v13  ;;  %v818_v23 = vadd.f32 %v786_v16, %v721_v15  ;;  %944 = vst.msk [vmem:[%s1323_s1 + $0x40] sm:$0xff] %vm8_vm0, %v912_v18  ;;  %v884_v28 = vmul.f32 0.5, %v852_v17  ;;  %v723_v29 = vadd.f32 %v879_v63, %v786_v16  ;;  %v862_v15 = vld [vmem:[#allocation3 + $0xe0] sm:$0xff] }
  0x72   :  { %v914_v27 = vadd.f32 %v882_v20, %v817_v19  ;;  %v788_v30 = vmul.f32 1.5, %v851_v12  ;;  %v819_v33 = vadd.f32 %v787_v25, %v722_v21  ;;  %v724_v34 = vadd.f32 %v880_v5, %v787_v25  ;;  %v864_v25 = vld [vmem:[#allocation3 + $0xf0] sm:$0xff] }
  0x73   :  { %945 = vst.msk [vmem:[%s1323_s1 + $0x48] sm:$0xff] %vm8_vm0, %v913_v22  ;;  %v915_v32 = vadd.f32 %v883_v24, %v818_v23  ;;  %v789_v35 = vmul.f32 1.5, %v852_v17  ;;  %v885_v38 = vmul.f32 0.5, %v853_v26  ;;  %v790_v40 = vmul.f32 1.5, %v853_v26 }
  0x74   :  { %946 = vst.msk [vmem:[%s1323_s1 + $0x50] sm:$0xff] %vm8_vm0, %v914_v27  ;;  %v820_v37 = vadd.f32 %v788_v30, %v723_v29  ;;  %v725_v39 = vadd.f32 %v881_v14, %v788_v30  ;;  %v916_v42 = vadd.f32 %v884_v28, %v819_v33  ;;  %v886_v44 = vmul.f32 0.5, %v854_v31 }
  0x75   :  { %947 = vst.msk [vmem:[%s1323_s1 + $0x58] sm:$0xff] %vm8_vm0, %v915_v32  ;;  %v821_v43 = vadd.f32 %v789_v35, %v724_v34  ;;  %v726_v45 = vadd.f32 %v882_v20, %v789_v35  ;;  %v887_v48 = vmul.f32 0.5, %v855_v36  ;;  %v791_v49 = vmul.f32 1.5, %v854_v31  ;;  %v863_v20 = vld [vmem:[#allocation3 + $0xe8] sm:$0xff]  ;;  %v865_v34 = vld [vmem:[#allocation3 + $0xf8] sm:$0xff] }
  0x76   :  { %v917_v46 = vadd.f32 %v885_v38, %v820_v37  ;;  %v822_v47 = vadd.f32 %v790_v40, %v725_v39  ;;  %948 = vst.msk [vmem:[%s1323_s1 + $0x60] sm:$0xff] %vm8_vm0, %v916_v42  ;;  %v888_v52 = vmul.f32 0.5, %v856_v41  ;;  %v727_v53 = vadd.f32 %v883_v24, %v790_v40  ;;  %v866_v39 = vld [vmem:[#allocation3 + $0x100] sm:$0xff] }
  0x77   :  { %v918_v51 = vadd.f32 %v886_v44, %v821_v43  ;;  %v792_v54 = vmul.f32 1.5, %v855_v36  ;;  %v823_v57 = vadd.f32 %v791_v49, %v726_v45  ;;  %v728_v58 = vadd.f32 %v884_v28, %v791_v49  ;;  %v868_v49 = vld [vmem:[#allocation3 + $0x110] sm:$0xff] }
  0x78   :  { %949 = vst.msk [vmem:[%s1323_s1 + $0x68] sm:$0xff] %vm8_vm0, %v917_v46  ;;  %v919_v56 = vadd.f32 %v887_v48, %v822_v47  ;;  %v793_v59 = vmul.f32 1.5, %v856_v41  ;;  %v889_v62 = vmul.f32 0.5, %v857_v50  ;;  %v794_v0 = vmul.f32 1.5, %v857_v50 }
  0x79   :  { %950 = vst.msk [vmem:[%s1323_s1 + $0x70] sm:$0xff] %vm8_vm0, %v918_v51  ;;  %v824_v61 = vadd.f32 %v792_v54, %v727_v53  ;;  %v729_v63 = vadd.f32 %v885_v38, %v792_v54  ;;  %v920_v2 = vadd.f32 %v888_v52, %v823_v57  ;;  %v890_v4 = vmul.f32 0.5, %v858_v55 }
  0x7a   :  { %951 = vst.msk [vmem:[%s1323_s1 + $0x78] sm:$0xff] %vm8_vm0, %v919_v56  ;;  %v825_v3 = vadd.f32 %v793_v59, %v728_v58  ;;  %v730_v5 = vadd.f32 %v886_v44, %v793_v59  ;;  %v891_v8 = vmul.f32 0.5, %v859_v60  ;;  %v795_v9 = vmul.f32 1.5, %v858_v55  ;;  %v867_v44 = vld [vmem:[#allocation3 + $0x108] sm:$0xff]  ;;  %v869_v58 = vld [vmem:[#allocation3 + $0x118] sm:$0xff] }
  0x7b   :  { %v921_v6 = vadd.f32 %v889_v62, %v824_v61  ;;  %v826_v7 = vadd.f32 %v794_v0, %v729_v63  ;;  %952 = vst.msk [vmem:[%s1323_s1 + $0x80] sm:$0xff] %vm8_vm0, %v920_v2  ;;  %v892_v12 = vmul.f32 0.5, %v860_v1  ;;  %v731_v13 = vadd.f32 %v887_v48, %v794_v0  ;;  %v870_v63 = vld [vmem:[#allocation3 + $0x120] sm:$0xff] }
  0x7c   :  { %v922_v11 = vadd.f32 %v890_v4, %v825_v3  ;;  %v796_v14 = vmul.f32 1.5, %v859_v60  ;;  %v827_v17 = vadd.f32 %v795_v9, %v730_v5  ;;  %v732_v18 = vadd.f32 %v888_v52, %v795_v9 }
  0x7d   :  { %953 = vst.msk [vmem:[%s1323_s1 + $0x88] sm:$0xff] %vm8_vm0, %v921_v6  ;;  %v923_v16 = vadd.f32 %v891_v8, %v826_v7  ;;  %v797_v19 = vmul.f32 1.5, %v860_v1  ;;  %v893_v22 = vmul.f32 0.5, %v861_v10  ;;  %v798_v24 = vmul.f32 1.5, %v861_v10 }
  0x7e   :  { %954 = vst.msk [vmem:[%s1323_s1 + $0x90] sm:$0xff] %vm8_vm0, %v922_v11  ;;  %v828_v21 = vadd.f32 %v796_v14, %v731_v13  ;;  %v733_v23 = vadd.f32 %v889_v62, %v796_v14  ;;  %v924_v26 = vadd.f32 %v892_v12, %v827_v17  ;;  %v894_v28 = vmul.f32 0.5, %v862_v15 }
  0x7f   :  { %955 = vst.msk [vmem:[%s1323_s1 + $0x98] sm:$0xff] %vm8_vm0, %v923_v16  ;;  %v829_v27 = vadd.f32 %v797_v19, %v732_v18  ;;  %v734_v29 = vadd.f32 %v890_v4, %v797_v19  ;;  %v895_v32 = vmul.f32 0.5, %v863_v20  ;;  %v799_v33 = vmul.f32 1.5, %v862_v15  ;;  %v871_v4 = vld [vmem:[#allocation3 + $0x128] sm:$0xff] }
  0x80   :  { %v925_v30 = vadd.f32 %v893_v22, %v828_v21  ;;  %v830_v31 = vadd.f32 %v798_v24, %v733_v23  ;;  %956 = vst.msk [vmem:[%s1323_s1 + $0xa0] sm:$0xff] %vm8_vm0, %v924_v26  ;;  %v896_v36 = vmul.f32 0.5, %v864_v25  ;;  %v735_v37 = vadd.f32 %v891_v8, %v798_v24 }
  0x81   :  { %v926_v35 = vadd.f32 %v894_v28, %v829_v27  ;;  %v800_v38 = vmul.f32 1.5, %v863_v20  ;;  %v831_v41 = vadd.f32 %v799_v33, %v734_v29  ;;  %v736_v42 = vadd.f32 %v892_v12, %v799_v33 }
  0x82   :  { %957 = vst.msk [vmem:[%s1323_s1 + $0xa8] sm:$0xff] %vm8_vm0, %v925_v30  ;;  %v927_v40 = vadd.f32 %v895_v32, %v830_v31  ;;  %v801_v43 = vmul.f32 1.5, %v864_v25  ;;  %v897_v46 = vmul.f32 0.5, %v865_v34  ;;  %v802_v48 = vmul.f32 1.5, %v865_v34 }
  0x83   :  { %958 = vst.msk [vmem:[%s1323_s1 + $0xb0] sm:$0xff] %vm8_vm0, %v926_v35  ;;  %v832_v45 = vadd.f32 %v800_v38, %v735_v37  ;;  %v737_v47 = vadd.f32 %v893_v22, %v800_v38  ;;  %v928_v50 = vadd.f32 %v896_v36, %v831_v41  ;;  %v898_v52 = vmul.f32 0.5, %v866_v39 }
  0x84   :  { %959 = vst.msk [vmem:[%s1323_s1 + $0xb8] sm:$0xff] %vm8_vm0, %v927_v40  ;;  %v833_v51 = vadd.f32 %v801_v43, %v736_v42  ;;  %v738_v53 = vadd.f32 %v894_v28, %v801_v43  ;;  %v899_v56 = vmul.f32 0.5, %v867_v44  ;;  %v803_v57 = vmul.f32 1.5, %v866_v39 }
  0x85   :  { %v929_v54 = vadd.f32 %v897_v46, %v832_v45  ;;  %v834_v55 = vadd.f32 %v802_v48, %v737_v47  ;;  %960 = vst.msk [vmem:[%s1323_s1 + $0xc0] sm:$0xff] %vm8_vm0, %v928_v50  ;;  %v900_v60 = vmul.f32 0.5, %v868_v49  ;;  %v739_v61 = vadd.f32 %v895_v32, %v802_v48 }
  0x86   :  { %v930_v59 = vadd.f32 %v898_v52, %v833_v51  ;;  %v804_v62 = vmul.f32 1.5, %v867_v44  ;;  %v835_v1 = vadd.f32 %v803_v57, %v738_v53  ;;  %v740_v2 = vadd.f32 %v896_v36, %v803_v57 }
  0x87   :  { %961 = vst.msk [vmem:[%s1323_s1 + $0xc8] sm:$0xff] %vm8_vm0, %v929_v54  ;;  %v931_v0 = vadd.f32 %v899_v56, %v834_v55  ;;  %v805_v3 = vmul.f32 1.5, %v868_v49  ;;  %v901_v6 = vmul.f32 0.5, %v869_v58  ;;  %v806_v8 = vmul.f32 1.5, %v869_v58 }
  0x88   :  { %962 = vst.msk [vmem:[%s1323_s1 + $0xd0] sm:$0xff] %vm8_vm0, %v930_v59  ;;  %v836_v5 = vadd.f32 %v804_v62, %v739_v61  ;;  %v741_v7 = vadd.f32 %v897_v46, %v804_v62  ;;  %v932_v9 = vadd.f32 %v900_v60, %v835_v1  ;;  %v902_v11 = vmul.f32 0.5, %v870_v63 }
  0x89   :  { %963 = vst.msk [vmem:[%s1323_s1 + $0xd8] sm:$0xff] %vm8_vm0, %v931_v0  ;;  %v837_v10 = vadd.f32 %v805_v3, %v740_v2  ;;  %v903_v14 = vmul.f32 0.5, %v871_v4 }
  0x8a   :  { %v933_v12 = vadd.f32 %v901_v6, %v836_v5  ;;  %v838_v13 = vadd.f32 %v806_v8, %v741_v7  ;;  %964 = vst.msk [vmem:[%s1323_s1 + $0xe0] sm:$0xff] %vm8_vm0, %v932_v9 }
  0x8b   :  { %v934_v15 = vadd.f32 %v902_v11, %v837_v10 }
  0x8c   :  { %965 = vst.msk [vmem:[%s1323_s1 + $0xe8] sm:$0xff] %vm8_vm0, %v933_v12  ;;  %v935_v16 = vadd.f32 %v903_v14, %v838_v13 }
  0x8d   :  { %966 = vst.msk [vmem:[%s1323_s1 + $0xf0] sm:$0xff] %vm8_vm0, %v934_v15 }
  0x8e   :  { %967 = vst.msk [vmem:[%s1323_s1 + $0xf8] sm:$0xff] %vm8_vm0, %v935_v16 }

</bundles_post_ra>
